<compile_context>
chip_gen: v7x
topology: tpu7x:2x2x1
jax: 0.10.0
libtpu: 0.0.40
codegen_flags: <defaults>
</compile_context>

<pallas_src>
import functools

import jax
import jax.numpy as jnp
from jax.experimental import pallas as pl
from jax.experimental.pallas import tpu as pltpu

_LOG2E = 1.4426950408889634  # log2(e), folded into the per-bin scalar path.


def _device_kind() -> str:
    try:
        dev = jax.devices()[0]
        return (getattr(dev, "device_kind", "") or "").lower()
    except Exception:
        return ""


def _num_tensorcores(kind: str) -> int:
    # v7x exposes 2 TensorCores per chip; older generations present 1.
    return 2 if ("v7" in kind or "tpu7" in kind or "7x" in kind) else 1


def _default_compute_dtype(kind: str):
    # bf16 VALU/EUP exists on v6e/v7x; v5e and older stay f32.
    if "v6" in kind or "v7" in kind or "tpu7" in kind or "7x" in kind:
        return jnp.bfloat16
    return jnp.float32


def _choose_tm(n_rows: int, n_cols: int, num_cores: int) -> int:
    """Row tile: ~2 MiB f32 input tiles amortize the ~0.35 us/grid-step
    overhead to <1%.  On multi-TensorCore parts (v7x) cap tm so the
    'parallel' row axis yields >= 2 grid steps per core for load balance;
    on 1-TC parts extra steps only add overhead, so prefer one full tile
    when it fits.  tm is a multiple of 8 unless it equals the full row dim
    (both satisfy the (8,128) block-shape rule)."""
    if n_rows <= 8:
        return n_rows
    bytes_per_row = max(1, n_cols) * 4
    tm = min(n_rows, max(8, (2 << 20) // bytes_per_row))
    if num_cores > 1 and n_rows >= 16 * num_cores:
        per = -(-n_rows // (2 * num_cores))      # ceil: ~2 steps per core
        per = ((per + 7) // 8) * 8
        tm = min(tm, per)
    if tm < n_rows:
        tm = max(8, (tm // 8) * 8)
    return tm


def _dist2pix_kernel(c_ref, lvl_ref, s_ref, d_ref, o_ref, *,
                     compute_dtype, subtract_max):
    """c_ref:(B,) SMEM, lvl_ref:(B,) SMEM, s_ref:(1,) SMEM,
    d_ref/o_ref:(tm, M) VMEM f32."""
    d = d_ref[...]                                   # (tm, M) f32
    s = jnp.maximum(s_ref[0], jnp.float32(0.1))      # clamp(softness, min=0.1)
    # Fold log2(e) into the scalar so the per-bin exp is a single exp2 (saves
    # the exp's internal *log2e multiply on the saturated VALU slot).
    neg_k = -_LOG2E / (s * s)                        # scalar path (SMEM/sALU)
    B = c_ref.shape[0]
    cs = [c_ref[b] for b in range(B)]
    lvls = [lvl_ref[b] for b in range(B)]

    cdt = jnp.dtype(compute_dtype)
    if cdt != jnp.dtype(jnp.float32):
        # bf16 vector path (v6e/v7x): 2x elements per vreg on the VALU slot.
        d_c = d.astype(cdt)
        neg_k_c = neg_k.astype(cdt)
        cs_c = [c.astype(cdt) for c in cs]
        lvls_c = [l.astype(cdt) for l in lvls]
    else:
        d_c, neg_k_c, cs_c, lvls_c = d, neg_k, cs, lvls

    # Optional exact-softmax fallback for pathological inputs (all bins
    # further than ~9*s from d would otherwise underflow every exp).
    m = None
    if subtract_max:
        for b in range(B):
            t = d_c - cs_c[b]
            a = t * t * neg_k_c
            m = a if m is None else jnp.maximum(m, a)

    # Single unrolled pass: weighted numerator / denominator of the softmax.
    num = None
    den = None
    for b in range(B):
        t = d_c - cs_c[b]
        arg = t * t * neg_k_c                        # <= 0 (log2 scale)
        if m is not None:
            arg = arg - m
        e = jnp.exp2(arg)                            # EUP slot
        w = e * lvls_c[b]
        num = w if num is None else num + w
        den = e if den is None else den + e

    num32 = num.astype(jnp.float32)
    # Floor guards den == 0 (all exps underflowed) -> 0 output instead of NaN.
    den32 = jnp.maximum(den.astype(jnp.float32), jnp.float32(1e-30))
    o_ref[...] = num32 * pl.reciprocal(den32, approx=True)


def distance_to_pixel_map(dists, bin_centers, levels, softness, *,
                          compute_dtype=None, subtract_max=False, tm=None):
    """dists: (..., M) f32; bin_centers/levels: (B,) f32; softness: scalar."""
    dists = jnp.asarray(dists, jnp.float32)
    orig_shape = dists.shape
    d2 = dists.reshape(1, -1) if dists.ndim < 2 else dists.reshape(-1, orig_shape[-1])
    n_rows, n_cols = d2.shape

    bin_centers = jnp.asarray(bin_centers, jnp.float32).reshape(-1)
    levels = jnp.asarray(levels, jnp.float32).reshape(-1)
    softness_arr = jnp.asarray(softness, jnp.float32).reshape((1,))

    kind = _device_kind()
    if compute_dtype is None:
        compute_dtype = _default_compute_dtype(kind)
    if tm is None:
        tm = _choose_tm(n_rows, n_cols, _num_tensorcores(kind))
    tm = int(tm)

    out = pl.pallas_call(
        functools.partial(_dist2pix_kernel,
                          compute_dtype=jnp.dtype(compute_dtype),
                          subtract_max=bool(subtract_max)),
        out_shape=jax.ShapeDtypeStruct((n_rows, n_cols), jnp.float32),
        grid_spec=pltpu.PrefetchScalarGridSpec(
            num_scalar_prefetch=0,
            grid=(pl.cdiv(n_rows, tm),),
            in_specs=[
                pl.BlockSpec(memory_space=pltpu.SMEM),        # bin_centers (B,)
                pl.BlockSpec(memory_space=pltpu.SMEM),        # levels      (B,)
                pl.BlockSpec(memory_space=pltpu.SMEM),        # softness    (1,)
                pl.BlockSpec((tm, n_cols), lambda i: (i, 0)), # dists row tile
            ],
            out_specs=pl.BlockSpec((tm, n_cols), lambda i: (i, 0)),
        ),
        compiler_params=pltpu.CompilerParams(
            dimension_semantics=("parallel",),
            vmem_limit_bytes=32 << 20,
        ),
    )(bin_centers, levels, softness_arr, d2)

    return out.reshape(orig_shape)


def _reference(dists, bin_centers, levels, softness):
    d = dists[..., None]
    c = bin_centers.reshape(1, 1, -1)
    lv = levels.reshape(1, 1, -1)
    s = jnp.maximum(softness, 0.1)
    scores = -(d - c) ** 2 / (s * s)
    w = jax.nn.softmax(scores, axis=-1)
    return (w * lv).sum(axis=-1)


if __name__ == "__main__":
    key = jax.random.PRNGKey(0)

    # Small protein-style problem: 200x120 pairwise-distance map, 16 bins.
    N, M, B = 200, 120, 16
    dists = jax.random.uniform(key, (N, M), jnp.float32, minval=0.0, maxval=25.0)

    bin_centers = jnp.linspace(2.0, 22.0, B, dtype=jnp.float32)
    levels = jnp.linspace(0.0, 1.0, B, dtype=jnp.float32)
    init_softness = jnp.float32(1.5)

    ref = _reference(dists, bin_centers, levels, init_softness)

    # 1) Forced-f32 path with a small explicit row tile: exercises the
    #    multi-step grid with a ragged last row tile and the unpadded
    #    (non-multiple-of-128) lane dimension.  Tight tolerance.
    out_f32 = distance_to_pixel_map(dists, bin_centers, levels, init_softness,
                                    compute_dtype=jnp.float32, tm=64)
    out_f32 = jax.block_until_ready(out_f32)
    assert out_f32.shape == (N, M) and out_f32.dtype == jnp.float32
    assert jnp.allclose(out_f32, ref, atol=2e-3, rtol=2e-3), "f32 path mismatch"

    # 2) Auto path: generation-gated compute dtype (bf16 on v6e/v7x, f32 on
    #    v5e/older) and auto tile size.  bf16 trades ~1e-2 absolute error for
    #    ~2x fewer VALU bundles on bf16-capable parts.
    out_auto = distance_to_pixel_map(dists, bin_centers, levels, init_softness)
    out_auto = jax.block_until_ready(out_auto)
    auto_dt = _default_compute_dtype(_device_kind())
    tol = 2e-3 if jnp.dtype(auto_dt) == jnp.dtype(jnp.float32) else 4e-2
    assert out_auto.shape == (N, M) and out_auto.dtype == jnp.float32
    assert jnp.allclose(out_auto, ref, atol=tol, rtol=tol), "auto path mismatch"

    # 3) Pathological-softness fallback: with softness at the 0.1 clamp,
    #    distances far outside the bin range underflow every exp; the
    #    subtract_max=True path reproduces the reference softmax.
    hard_soft = jnp.float32(0.05)   # clamps to 0.1 inside the op
    ref_hard = _reference(dists, bin_centers, levels, hard_soft)
    out_hard = distance_to_pixel_map(dists, bin_centers, levels, hard_soft,
                                     compute_dtype=jnp.float32, subtract_max=True)
    out_hard = jax.block_until_ready(out_hard)
    assert jnp.allclose(out_hard, ref_hard, atol=2e-3, rtol=2e-3), "max-path mismatch"

    print("KERNEL_OK")
</pallas_src>

<mosaic_0001>
module attributes {stable_mosaic.version = 11 : i64} {
  func.func @_dist2pix_kernel(%arg0: i32, %arg1: memref<16xf32, #tpu.memory_space<smem>>, %arg2: memref<16xf32, #tpu.memory_space<smem>>, %arg3: memref<1xf32, #tpu.memory_space<smem>>, %arg4: memref<64x120xf32, #tpu.memory_space<vmem>>, %arg5: memref<64x120xf32, #tpu.memory_space<vmem>>) attributes {dimension_semantics = [#tpu.dimension_semantics<parallel>], iteration_bounds = array<i64: 4>, scalar_prefetch = 0 : i64, scratch_operands = 0 : i64, tpu.core_type = #tpu.core_type<tc>, window_params = [{transform_indices = @transform_0, window_bounds = array<i64: 16>}, {transform_indices = @transform_1, window_bounds = array<i64: 16>}, {transform_indices = @transform_2, window_bounds = array<i64: 1>}, {transform_indices = @transform_3, window_bounds = array<i64: 64, 120>}, {transform_indices = @transform_4, window_bounds = array<i64: 64, 120>}]} {
    %c0 = arith.constant 0 : index
    %c0_0 = arith.constant 0 : index
    %0 = vector.load %arg4[%c0, %c0_0] : memref<64x120xf32, #tpu.memory_space<vmem>>, vector<64x120xf32>
    %c0_1 = arith.constant 0 : index
    %1 = memref.load %arg3[%c0_1] : memref<1xf32, #tpu.memory_space<smem>>
    %cst = arith.constant 1.000000e-01 : f32
    %2 = arith.maximumf %1, %cst : f32
    %3 = arith.mulf %2, %2 : f32
    %cst_2 = arith.constant -1.44269502 : f32
    %4 = arith.divf %cst_2, %3 : f32
    %c0_3 = arith.constant 0 : index
    %5 = memref.load %arg1[%c0_3] : memref<16xf32, #tpu.memory_space<smem>>
    %c1 = arith.constant 1 : index
    %6 = memref.load %arg1[%c1] : memref<16xf32, #tpu.memory_space<smem>>
    %c2 = arith.constant 2 : index
    %7 = memref.load %arg1[%c2] : memref<16xf32, #tpu.memory_space<smem>>
    %c3 = arith.constant 3 : index
    %8 = memref.load %arg1[%c3] : memref<16xf32, #tpu.memory_space<smem>>
    %c4 = arith.constant 4 : index
    %9 = memref.load %arg1[%c4] : memref<16xf32, #tpu.memory_space<smem>>
    %c5 = arith.constant 5 : index
    %10 = memref.load %arg1[%c5] : memref<16xf32, #tpu.memory_space<smem>>
    %c6 = arith.constant 6 : index
    %11 = memref.load %arg1[%c6] : memref<16xf32, #tpu.memory_space<smem>>
    %c7 = arith.constant 7 : index
    %12 = memref.load %arg1[%c7] : memref<16xf32, #tpu.memory_space<smem>>
    %c8 = arith.constant 8 : index
    %13 = memref.load %arg1[%c8] : memref<16xf32, #tpu.memory_space<smem>>
    %c9 = arith.constant 9 : index
    %14 = memref.load %arg1[%c9] : memref<16xf32, #tpu.memory_space<smem>>
    %c10 = arith.constant 10 : index
    %15 = memref.load %arg1[%c10] : memref<16xf32, #tpu.memory_space<smem>>
    %c11 = arith.constant 11 : index
    %16 = memref.load %arg1[%c11] : memref<16xf32, #tpu.memory_space<smem>>
    %c12 = arith.constant 12 : index
    %17 = memref.load %arg1[%c12] : memref<16xf32, #tpu.memory_space<smem>>
    %c13 = arith.constant 13 : index
    %18 = memref.load %arg1[%c13] : memref<16xf32, #tpu.memory_space<smem>>
    %c14 = arith.constant 14 : index
    %19 = memref.load %arg1[%c14] : memref<16xf32, #tpu.memory_space<smem>>
    %c15 = arith.constant 15 : index
    %20 = memref.load %arg1[%c15] : memref<16xf32, #tpu.memory_space<smem>>
    %c0_4 = arith.constant 0 : index
    %21 = memref.load %arg2[%c0_4] : memref<16xf32, #tpu.memory_space<smem>>
    %c1_5 = arith.constant 1 : index
    %22 = memref.load %arg2[%c1_5] : memref<16xf32, #tpu.memory_space<smem>>
    %c2_6 = arith.constant 2 : index
    %23 = memref.load %arg2[%c2_6] : memref<16xf32, #tpu.memory_space<smem>>
    %c3_7 = arith.constant 3 : index
    %24 = memref.load %arg2[%c3_7] : memref<16xf32, #tpu.memory_space<smem>>
    %c4_8 = arith.constant 4 : index
    %25 = memref.load %arg2[%c4_8] : memref<16xf32, #tpu.memory_space<smem>>
    %c5_9 = arith.constant 5 : index
    %26 = memref.load %arg2[%c5_9] : memref<16xf32, #tpu.memory_space<smem>>
    %c6_10 = arith.constant 6 : index
    %27 = memref.load %arg2[%c6_10] : memref<16xf32, #tpu.memory_space<smem>>
    %c7_11 = arith.constant 7 : index
    %28 = memref.load %arg2[%c7_11] : memref<16xf32, #tpu.memory_space<smem>>
    %c8_12 = arith.constant 8 : index
    %29 = memref.load %arg2[%c8_12] : memref<16xf32, #tpu.memory_space<smem>>
    %c9_13 = arith.constant 9 : index
    %30 = memref.load %arg2[%c9_13] : memref<16xf32, #tpu.memory_space<smem>>
    %c10_14 = arith.constant 10 : index
    %31 = memref.load %arg2[%c10_14] : memref<16xf32, #tpu.memory_space<smem>>
    %c11_15 = arith.constant 11 : index
    %32 = memref.load %arg2[%c11_15] : memref<16xf32, #tpu.memory_space<smem>>
    %c12_16 = arith.constant 12 : index
    %33 = memref.load %arg2[%c12_16] : memref<16xf32, #tpu.memory_space<smem>>
    %c13_17 = arith.constant 13 : index
    %34 = memref.load %arg2[%c13_17] : memref<16xf32, #tpu.memory_space<smem>>
    %c14_18 = arith.constant 14 : index
    %35 = memref.load %arg2[%c14_18] : memref<16xf32, #tpu.memory_space<smem>>
    %c15_19 = arith.constant 15 : index
    %36 = memref.load %arg2[%c15_19] : memref<16xf32, #tpu.memory_space<smem>>
    %37 = vector.broadcast %5 : f32 to vector<64x120xf32>
    %38 = arith.subf %0, %37 : vector<64x120xf32>
    %39 = arith.mulf %38, %38 : vector<64x120xf32>
    %40 = vector.broadcast %4 : f32 to vector<64x120xf32>
    %41 = arith.mulf %39, %40 : vector<64x120xf32>
    %42 = math.exp2 %41 : vector<64x120xf32>
    %43 = vector.broadcast %21 : f32 to vector<64x120xf32>
    %44 = arith.mulf %42, %43 : vector<64x120xf32>
    %45 = vector.broadcast %6 : f32 to vector<64x120xf32>
    %46 = arith.subf %0, %45 : vector<64x120xf32>
    %47 = arith.mulf %46, %46 : vector<64x120xf32>
    %48 = vector.broadcast %4 : f32 to vector<64x120xf32>
    %49 = arith.mulf %47, %48 : vector<64x120xf32>
    %50 = math.exp2 %49 : vector<64x120xf32>
    %51 = vector.broadcast %22 : f32 to vector<64x120xf32>
    %52 = arith.mulf %50, %51 : vector<64x120xf32>
    %53 = arith.addf %44, %52 : vector<64x120xf32>
    %54 = arith.addf %42, %50 : vector<64x120xf32>
    %55 = vector.broadcast %7 : f32 to vector<64x120xf32>
    %56 = arith.subf %0, %55 : vector<64x120xf32>
    %57 = arith.mulf %56, %56 : vector<64x120xf32>
    %58 = vector.broadcast %4 : f32 to vector<64x120xf32>
    %59 = arith.mulf %57, %58 : vector<64x120xf32>
    %60 = math.exp2 %59 : vector<64x120xf32>
    %61 = vector.broadcast %23 : f32 to vector<64x120xf32>
    %62 = arith.mulf %60, %61 : vector<64x120xf32>
    %63 = arith.addf %53, %62 : vector<64x120xf32>
    %64 = arith.addf %54, %60 : vector<64x120xf32>
    %65 = vector.broadcast %8 : f32 to vector<64x120xf32>
    %66 = arith.subf %0, %65 : vector<64x120xf32>
    %67 = arith.mulf %66, %66 : vector<64x120xf32>
    %68 = vector.broadcast %4 : f32 to vector<64x120xf32>
    %69 = arith.mulf %67, %68 : vector<64x120xf32>
    %70 = math.exp2 %69 : vector<64x120xf32>
    %71 = vector.broadcast %24 : f32 to vector<64x120xf32>
    %72 = arith.mulf %70, %71 : vector<64x120xf32>
    %73 = arith.addf %63, %72 : vector<64x120xf32>
    %74 = arith.addf %64, %70 : vector<64x120xf32>
    %75 = vector.broadcast %9 : f32 to vector<64x120xf32>
    %76 = arith.subf %0, %75 : vector<64x120xf32>
    %77 = arith.mulf %76, %76 : vector<64x120xf32>
    %78 = vector.broadcast %4 : f32 to vector<64x120xf32>
    %79 = arith.mulf %77, %78 : vector<64x120xf32>
    %80 = math.exp2 %79 : vector<64x120xf32>
    %81 = vector.broadcast %25 : f32 to vector<64x120xf32>
    %82 = arith.mulf %80, %81 : vector<64x120xf32>
    %83 = arith.addf %73, %82 : vector<64x120xf32>
    %84 = arith.addf %74, %80 : vector<64x120xf32>
    %85 = vector.broadcast %10 : f32 to vector<64x120xf32>
    %86 = arith.subf %0, %85 : vector<64x120xf32>
    %87 = arith.mulf %86, %86 : vector<64x120xf32>
    %88 = vector.broadcast %4 : f32 to vector<64x120xf32>
    %89 = arith.mulf %87, %88 : vector<64x120xf32>
    %90 = math.exp2 %89 : vector<64x120xf32>
    %91 = vector.broadcast %26 : f32 to vector<64x120xf32>
    %92 = arith.mulf %90, %91 : vector<64x120xf32>
    %93 = arith.addf %83, %92 : vector<64x120xf32>
    %94 = arith.addf %84, %90 : vector<64x120xf32>
    %95 = vector.broadcast %11 : f32 to vector<64x120xf32>
    %96 = arith.subf %0, %95 : vector<64x120xf32>
    %97 = arith.mulf %96, %96 : vector<64x120xf32>
    %98 = vector.broadcast %4 : f32 to vector<64x120xf32>
    %99 = arith.mulf %97, %98 : vector<64x120xf32>
    %100 = math.exp2 %99 : vector<64x120xf32>
    %101 = vector.broadcast %27 : f32 to vector<64x120xf32>
    %102 = arith.mulf %100, %101 : vector<64x120xf32>
    %103 = arith.addf %93, %102 : vector<64x120xf32>
    %104 = arith.addf %94, %100 : vector<64x120xf32>
    %105 = vector.broadcast %12 : f32 to vector<64x120xf32>
    %106 = arith.subf %0, %105 : vector<64x120xf32>
    %107 = arith.mulf %106, %106 : vector<64x120xf32>
    %108 = vector.broadcast %4 : f32 to vector<64x120xf32>
    %109 = arith.mulf %107, %108 : vector<64x120xf32>
    %110 = math.exp2 %109 : vector<64x120xf32>
    %111 = vector.broadcast %28 : f32 to vector<64x120xf32>
    %112 = arith.mulf %110, %111 : vector<64x120xf32>
    %113 = arith.addf %103, %112 : vector<64x120xf32>
    %114 = arith.addf %104, %110 : vector<64x120xf32>
    %115 = vector.broadcast %13 : f32 to vector<64x120xf32>
    %116 = arith.subf %0, %115 : vector<64x120xf32>
    %117 = arith.mulf %116, %116 : vector<64x120xf32>
    %118 = vector.broadcast %4 : f32 to vector<64x120xf32>
    %119 = arith.mulf %117, %118 : vector<64x120xf32>
    %120 = math.exp2 %119 : vector<64x120xf32>
    %121 = vector.broadcast %29 : f32 to vector<64x120xf32>
    %122 = arith.mulf %120, %121 : vector<64x120xf32>
    %123 = arith.addf %113, %122 : vector<64x120xf32>
    %124 = arith.addf %114, %120 : vector<64x120xf32>
    %125 = vector.broadcast %14 : f32 to vector<64x120xf32>
    %126 = arith.subf %0, %125 : vector<64x120xf32>
    %127 = arith.mulf %126, %126 : vector<64x120xf32>
    %128 = vector.broadcast %4 : f32 to vector<64x120xf32>
    %129 = arith.mulf %127, %128 : vector<64x120xf32>
    %130 = math.exp2 %129 : vector<64x120xf32>
    %131 = vector.broadcast %30 : f32 to vector<64x120xf32>
    %132 = arith.mulf %130, %131 : vector<64x120xf32>
    %133 = arith.addf %123, %132 : vector<64x120xf32>
    %134 = arith.addf %124, %130 : vector<64x120xf32>
    %135 = vector.broadcast %15 : f32 to vector<64x120xf32>
    %136 = arith.subf %0, %135 : vector<64x120xf32>
    %137 = arith.mulf %136, %136 : vector<64x120xf32>
    %138 = vector.broadcast %4 : f32 to vector<64x120xf32>
    %139 = arith.mulf %137, %138 : vector<64x120xf32>
    %140 = math.exp2 %139 : vector<64x120xf32>
    %141 = vector.broadcast %31 : f32 to vector<64x120xf32>
    %142 = arith.mulf %140, %141 : vector<64x120xf32>
    %143 = arith.addf %133, %142 : vector<64x120xf32>
    %144 = arith.addf %134, %140 : vector<64x120xf32>
    %145 = vector.broadcast %16 : f32 to vector<64x120xf32>
    %146 = arith.subf %0, %145 : vector<64x120xf32>
    %147 = arith.mulf %146, %146 : vector<64x120xf32>
    %148 = vector.broadcast %4 : f32 to vector<64x120xf32>
    %149 = arith.mulf %147, %148 : vector<64x120xf32>
    %150 = math.exp2 %149 : vector<64x120xf32>
    %151 = vector.broadcast %32 : f32 to vector<64x120xf32>
    %152 = arith.mulf %150, %151 : vector<64x120xf32>
    %153 = arith.addf %143, %152 : vector<64x120xf32>
    %154 = arith.addf %144, %150 : vector<64x120xf32>
    %155 = vector.broadcast %17 : f32 to vector<64x120xf32>
    %156 = arith.subf %0, %155 : vector<64x120xf32>
    %157 = arith.mulf %156, %156 : vector<64x120xf32>
    %158 = vector.broadcast %4 : f32 to vector<64x120xf32>
    %159 = arith.mulf %157, %158 : vector<64x120xf32>
    %160 = math.exp2 %159 : vector<64x120xf32>
    %161 = vector.broadcast %33 : f32 to vector<64x120xf32>
    %162 = arith.mulf %160, %161 : vector<64x120xf32>
    %163 = arith.addf %153, %162 : vector<64x120xf32>
    %164 = arith.addf %154, %160 : vector<64x120xf32>
    %165 = vector.broadcast %18 : f32 to vector<64x120xf32>
    %166 = arith.subf %0, %165 : vector<64x120xf32>
    %167 = arith.mulf %166, %166 : vector<64x120xf32>
    %168 = vector.broadcast %4 : f32 to vector<64x120xf32>
    %169 = arith.mulf %167, %168 : vector<64x120xf32>
    %170 = math.exp2 %169 : vector<64x120xf32>
    %171 = vector.broadcast %34 : f32 to vector<64x120xf32>
    %172 = arith.mulf %170, %171 : vector<64x120xf32>
    %173 = arith.addf %163, %172 : vector<64x120xf32>
    %174 = arith.addf %164, %170 : vector<64x120xf32>
    %175 = vector.broadcast %19 : f32 to vector<64x120xf32>
    %176 = arith.subf %0, %175 : vector<64x120xf32>
    %177 = arith.mulf %176, %176 : vector<64x120xf32>
    %178 = vector.broadcast %4 : f32 to vector<64x120xf32>
    %179 = arith.mulf %177, %178 : vector<64x120xf32>
    %180 = math.exp2 %179 : vector<64x120xf32>
    %181 = vector.broadcast %35 : f32 to vector<64x120xf32>
    %182 = arith.mulf %180, %181 : vector<64x120xf32>
    %183 = arith.addf %173, %182 : vector<64x120xf32>
    %184 = arith.addf %174, %180 : vector<64x120xf32>
    %185 = vector.broadcast %20 : f32 to vector<64x120xf32>
    %186 = arith.subf %0, %185 : vector<64x120xf32>
    %187 = arith.mulf %186, %186 : vector<64x120xf32>
    %188 = vector.broadcast %4 : f32 to vector<64x120xf32>
    %189 = arith.mulf %187, %188 : vector<64x120xf32>
    %190 = math.exp2 %189 : vector<64x120xf32>
    %191 = vector.broadcast %36 : f32 to vector<64x120xf32>
    %192 = arith.mulf %190, %191 : vector<64x120xf32>
    %193 = arith.addf %183, %192 : vector<64x120xf32>
    %194 = arith.addf %184, %190 : vector<64x120xf32>
    %cst_20 = arith.constant 1.000000e-30 : f32
    %195 = vector.broadcast %cst_20 : f32 to vector<64x120xf32>
    %196 = arith.maximumf %194, %195 : vector<64x120xf32>
    %197 = tpu.reciprocal %196 {approx = true} : vector<64x120xf32> -> vector<64x120xf32>
    %198 = arith.mulf %193, %197 : vector<64x120xf32>
    %c0_21 = arith.constant 0 : index
    %c0_22 = arith.constant 0 : index
    %199 = vector.load %arg5[%c0_21, %c0_22] : memref<64x120xf32, #tpu.memory_space<vmem>>, vector<64x120xf32>
    tpu.vector_store %arg5[%c0_21, %c0_22], %198 {strides = array<i32>} : memref<64x120xf32, #tpu.memory_space<vmem>>, vector<64x120xf32>,
    return
  }
  func.func @transform_0(%arg0: i32) -> i32 {
    %c0_i32 = arith.constant 0 : i32
    %c0_i32_0 = arith.constant 0 : i32
    return %c0_i32 : i32
  }
  func.func @transform_1(%arg0: i32) -> i32 {
    %c0_i32 = arith.constant 0 : i32
    %c0_i32_0 = arith.constant 0 : i32
    return %c0_i32 : i32
  }
  func.func @transform_2(%arg0: i32) -> i32 {
    %c0_i32 = arith.constant 0 : i32
    %c0_i32_0 = arith.constant 0 : i32
    return %c0_i32 : i32
  }
  func.func @transform_3(%arg0: i32) -> (i32, i32) {
    %c0_i32 = arith.constant 0 : i32
    %c0_i32_0 = arith.constant 0 : i32
    return %arg0, %c0_i32 : i32, i32
  }
  func.func @transform_4(%arg0: i32) -> (i32, i32) {
    %c0_i32 = arith.constant 0 : i32
    %c0_i32_0 = arith.constant 0 : i32
    return %arg0, %c0_i32 : i32, i32
  }
}

</mosaic_0001>

<bundles_post_ra>
// kernel: tpu_custom_call.1
= control target key start
LH: loop header
LB: loop body
LE: loop exit
PB: predicated region body
PF: predicated region fallthrough
CT: control target
= control target key end

     0   :  { %s3396_s0 = inlined_call_operand.vmem [shape: f32[16], index: 0, kind: input, shape index: {}]   ;;  %s3397_s1 = inlined_call_operand.vmem [shape: f32[16], index: 1, kind: input, shape index: {}]   ;;  %s3398_s2 = inlined_call_operand.<no memory space> [shape: f32[1], index: 2, kind: input, shape index: {}]   ;;  %s3399_s3 = inlined_call_operand.hbm [shape: f32[200,120], index: 3, kind: input, shape index: {}]   ;;  %s3400_s4 = inlined_call_operand.hbm [shape: f32[200,120], index: 4, kind: output, shape index: {}]  }
   0x1   :  { %9 = sst [smem:[#allocation2]] %s3398_s2 }
   0x2   :  { %10 = vsyncpa [#allocation6], 0 }
   0x3   :  { %11 = vsyncpa [#allocation8], 0 }
   0x4   :  { %12 = vsyncpa [#allocation4], 0 }
   0x5   :  { %14 = vsyncpa [#allocation4 + $0x1], 0 }
   0x6   :  { %15 = vsyncpa [#allocation5], 0 }
   0x7   :  { %17 = vsyncpa [#allocation5 + $0x1], 0  ;;  %s1946_s17 = smov 0   ;;  %s1948_s18 = smov 0  }
   0x8   :  { %s1950_s19 = smov 0   ;;  %s1952_s20 = smov 0  }
   0x9 LB: > { %s1967_s2 = sadd.s32 4294967295, %s1907_s20   ;;  %s1368_s21 = sadd.s32 4294967294, %s1907_s20   ;;  %s1907_s20 = sphi %s1952_s20, %s3649_s20   ;;  %s1903_s19 = sphi %s1950_s19, %s3648_s19   ;;  %s1899_s18 = sphi %s1948_s18, %s3647_s18   ;;  %s1895_s17 = sphi %s1946_s17, %s3646_s17  }
   0xa   : > { %s1971_s22 = sadd.s32 1, %s1907_s20   ;;  %s93_s23 = sadd.s32 1, %s1903_s19 }
   0xb   : > { %s90_s24 = ssub.s32 %s1907_s20, %s1971_s22  ;;  %p100_p0 = scmp.ne.s32.totalorder %s1903_s19, %s1899_s18 }
   0xc   : > { %p91_p1 = scmp.eq.s32.totalorder %s90_s24, 0  ;;  %p101_p2 = scmp.eq.s32.totalorder %s1907_s20, 0 }
   0xd   : > { %p106_p3 = scmp.ne.s32.totalorder %s1899_s18, %s1895_s17  ;;  %p3401_p4 = scmp.eq.s32.totalorder %s1967_s2, 0 }
   0xe   : > { %s1983_s25 = scalar_select %p91_p1, %s1903_s19, %s93_s23  }
   0xf   : > { %p1985_p5 = por %p101_p2, %p100_p0  ;;  %p1991_p6 = por %p3401_p4, %p106_p3 }
  0x10   : > { %p130_p7 = scmp.eq.s32.totalorder %s1967_s2, 3  ;;  %p136_p8 = scmp.eq.s32.totalorder %s1368_s21, 3 }
  0x11   : > { %s3419_s26 = scalar_select %p1985_p5, 1, 0 }
  0x12   : > { %s3420_s27 = scalar_select %p1991_p6, 1, 0 }
  0x13   : > { %p1369_p9 = scmp.ge.s32.totalorder %s1907_s20, 1  ;;  %p143_p10 = scmp.lt.s32.totalorder %s1907_s20, 5 }
  0x14   : > { %p1998_p11 = por %p130_p7, %p100_p0  ;;  %p2002_p12 = por %p136_p8, %p106_p3 }
  0x15   : > { %p2006_p13 = pnand %p1369_p9, %p143_p10  ;;  %s156_s7 = sshll.u32 %s3396_s0, 4  ;;  %s157_s7 = int_to_ptr.vmem [resolvable:$true] %s156_s7 }
  0x16   : > { %s3421_s28 = scalar_select %p1998_p11, 1, 0 }
  0x17   : > { %s3422_s29 = scalar_select %p2002_p12, 1, 0 }
  0x18   : > { %s3423_s30 = scalar_select %p2006_p13, 1, 0 }
  0x19   : > { %p1438_p1 = pneg %p2006_p13  ;;  %s167_s10 = sshll.u32 %s3397_s1, 4  ;;  %s168_s10 = int_to_ptr.vmem [resolvable:$true] %s167_s10 }
  0x1a   : > { %s1775_s12 = scalar_lea.vmem %s157_s7, 16  ;;  %p1783_p9 = scmp.lt.s32.totalorder %s157_s7, %s157_s7 }
  0x1b   : > { %p2020_p0 = pnand %p1438_p1, %p3401_p4  ;;  %p1776_p2 = scmp.ne.s32.totalorder %s157_s7, %s1775_s12 }
  0x1c   : > { %p1784_p10 = scmp.lt.s32.totalorder %s1775_s12, %s1775_s12 }
  0x1d   : > { %p1777_p3 = pneg %p2020_p0 }
  0x1e   : > { %p1785_p12 = por %p1784_p10, %p1783_p9 }
  0x1f   : > { %p1778_p7 = pnand %p1777_p3, %p1776_p2 }
  0x21   : > { %p1779_p8 = pneg %p1778_p7 }
  0x23   : > { %p1786_p11 = pnand %p1785_p12, %p1779_p8 }
  0x25   : > { %1789 = shalt.err (!%p1786_p11)
}
  0x26   : > { %s1909_s13 = smov [#allocation3]   ;;  %s1790_s14 = scalar_lea.vmem %s168_s10, 16 }
  0x27   : > { %1441 = dma.vmem_to_smem (!%p2020_p0), %s157_s7, 16, %s1909_s13, [#allocation6]  }
  0x28   : > { %p1791_p1 = scmp.ne.s32.totalorder %s168_s10, %s1790_s14  ;;  %p1798_p13 = scmp.lt.s32.totalorder %s168_s10, %s168_s10 }
  0x29   : > { %p1799_p5 = scmp.lt.s32.totalorder %s1790_s14, %s1790_s14 }
  0x2a   : > { %p1793_p4 = pnand %p1791_p1, %p1777_p3 }
  0x2b   : > { %p1800_p2 = por %p1799_p5, %p1798_p13 }
  0x2c   : > { %p1794_p6 = pneg %p1793_p4 }
  0x2e   : > { %p1801_p7 = pnand %p1800_p2, %p1794_p6 }
  0x30   : > { %1804 = shalt.err (!%p1801_p7)
}
  0x31   : > { %s1910_s15 = smov [#allocation7]   ;;  %p1372_p12 = scmp.ge.s32.totalorder %s1907_s20, 4 }
  0x32   : > { %1444 = dma.vmem_to_smem (!%p2020_p0), %s168_s10, 16, %s1910_s15, [#allocation8]  }
  0x33   : > { %177 = sbr.rel (%p1372_p12) target bundleno = 93 (0x5d), region = 28  ;;  %p3425_p11 = scmp.ne.s32.totalorder (!%p1372_p12), %s3419_s26, 0 }
  0x3a   : > { %180 = sbr.rel (!%p3425_p11) target bundleno = 93 (0x5d), region = 32  ;;  %s181_s16 = sand.u32 (%p3425_p11), 1, %s1903_s19  }
  0x3b   : > { %s1374_s21 = sshll.u32 (%p3425_p11), %s1907_s20, 3  ;;  %s1373_s23 = sshll.u32 (%p3425_p11), %s181_s16, 6 }
  0x3c   : > { %s187_s24 = ssub.s32 (%p3425_p11), 25, %s1374_s21  ;;  %s2038_s7 = scalar_lea.sflag (%p3425_p11), [#allocation4], %s181_s16 }
  0x3d   : > { %p188_p4 = scmp.lt.s32.totalorder (%p3425_p11), %s187_s24, 8  ;;  %s185_s8 = scalar_lea.vmem (%p3425_p11), [#allocation9], %s1373_s23 }
  0x41   : > { %s3651_s24 = smov (!%p188_p4, %s187_s24), 8 }
  0x42   : > { %s2035_s5 = sshll.u32 %s3651_s24, 7 }
  0x43   : > { %s192_s6 = ssub.s32 1024, %s2035_s5 }
  0x44   : > { %193 = vsyncadd %s2038_s7, %s192_s6  ;;  %p1376_p5 = scmp.ne.s32.totalorder %s2035_s5, 0  ;;  %s1424_s26 = sshll.u32 %s1907_s20, 10 }
  0x45   : > { %s2046_s11 = scalar_lea.hbm %s3399_s3, %s1424_s26  ;;  %s198_s12 = sshll.u32 %s185_s8, 4  ;;  %s2048_s12 = int_to_ptr.vmem [resolvable:$true] %s198_s12 }
  0x46   : > { %s1805_s13 = scalar_lea.hbm %s2046_s11, %s2035_s5  ;;  %s1809_s16 = scalar_lea.hbm %s3399_s3, 3200 }
  0x47   : > { %p1806_p6 = scmp.ne.s32.totalorder %s2046_s11, %s1805_s13  ;;  %p1810_p3 = scmp.lt.u32.totalorder %s2046_s11, %s3399_s3 }
  0x48   : > { %p1811_p8 = scmp.lt.u32.totalorder %s1809_s16, %s1805_s13  ;;  %p1813_p10 = scmp.lt.u32.totalorder %s1805_s13, %s2046_s11 }
  0x49   : > { %p1807_p13 = pnand %p1806_p6, %p1376_p5 }
  0x4a   : > { %p1812_p9 = por %p1811_p8, %p1810_p3 }
  0x4b   : > { %p1808_p0 = pneg %p1807_p13 }
  0x4c   : > { %p1814_p1 = por %p1813_p10, %p1812_p9 }
  0x4e   : > { %p1815_p2 = pnand %p1814_p1, %p1808_p0 }
  0x50   : > { %1818 = shalt.err (!%p1815_p2)
}
  0x51   : > { %s1819_s24 = scalar_lea.vmem %s2048_s12, %s2035_s5  ;;  %s1911_s6 = smov [#allocation9]  }
  0x52   : > { %p1820_p7 = scmp.ne.s32.totalorder %s2048_s12, %s1819_s24  ;;  %s1823_s8 = sshll.u32 %s1911_s6, 4  ;;  %s1824_s8 = int_to_ptr.vmem [resolvable:$false] %s1823_s8 }
  0x53   : > { %s1825_s26 = scalar_lea.vmem %s1824_s8, 2048  ;;  %p1826_p4 = scmp.lt.s32.totalorder %s2048_s12, %s1824_s8 }
  0x54   : > { %p1821_p12 = pnand %p1820_p7, %p1376_p5  ;;  %p1827_p6 = scmp.lt.s32.totalorder %s1825_s26, %s1819_s24 }
  0x56   : > { %p1822_p11 = pneg %p1821_p12  ;;  %p1828_p13 = por %p1827_p6, %p1826_p4 }
  0x58   : > { %p1829_p3 = pnand %p1828_p13, %p1822_p11 }
  0x5a   : > { %1832 = shalt.err (!%p1829_p3)
}
  0x5b   : > { %s1912_s9 = smov 128   ;;  %s1913_s10 = smov 8  }
  0x5c   : > { %204 = dma.hbm_to_vmem [thread:$0]  (%p1376_p5), %s2046_s11, %s2035_s5, %s2048_s12, %s2038_s7, %s1912_s9, %s1912_s9, %s1913_s10  }
  0x5d PF: > { %p3426_p0 = scmp.ne.s32.totalorder %s3423_s30, 0 }
  0x5f   : > { %210 = sbr.rel (%p3426_p0) target bundleno = 395 (0x18b), region = 36 }
  0x66   : > { %p3427_p8 = scmp.eq.s32.totalorder %s1967_s2, 0 }
  0x68   : > { %1878 = dma.done.wait (%p3427_p8), [#allocation6], 16   ;;  %p3428_p9 = pmov %p3427_p8 }
  0x69   : > { %p3429_p10 = pmov %p3427_p8 }
  0x6a   : > { %1880 = vsyncadd (%p3428_p9), [#allocation6], 4294967280 }
  0x6b   : > { %1882 = dma.done.wait (%p3429_p10), [#allocation8], 16   ;;  %p3430_p1 = pmov %p3427_p8 }
  0x6c   : > { %s2086_s5 = sand.u32 1, %s1899_s18   ;;  %p3431_p5 = scmp.ne.s32.totalorder %s3420_s27, 0 }
  0x6d   : > { %1884 = vsyncadd (%p3430_p1), [#allocation8], 4294967280  ;;  %s1383_s30 = sshll.u32 %s2086_s5, 6  ;;  %s221_s7 = scalar_lea.sflag [#allocation4], %s2086_s5 }
  0x6e   : > { %s2092_s11 = scalar_lea.vmem [#allocation9], %s1383_s30 }
  0x6f   : > { %1886 = dma.done.wait (%p3431_p5), %s221_s7, 1024  }
  0x70   : > { %1888 = vsyncadd (%p3431_p5), %s221_s7, 4294966272 }
  0x71   : > { %229 = sfence }
  0x72   : > { %s268_s12 = sld [smem:[#allocation2]]  ;;  %s1914_s13 = smov 0.1   ;;  %v2099_v2 = vld [vmem:[%s2092_s11] sm:$0xff]  ;;  %v2102_v4 = vld [vmem:[%s2092_s11 + $0x8] sm:$0xff]  ;;  %v2107_v5 = vld [vmem:[%s2092_s11 + $0x10] sm:$0xff] }
  0x73   : > { %s275_s16 = sld [smem:[#allocation3]]  ;;  %s1385_s21 = sld [smem:[#allocation3 + $0x1]]  ;;  %v2110_v6 = vld [vmem:[%s2092_s11 + $0x18] sm:$0xff]  ;;  %v2113_v7 = vld [vmem:[%s2092_s11 + $0x20] sm:$0xff]  ;;  %v2116_v8 = vld [vmem:[%s2092_s11 + $0x28] sm:$0xff]  ;;  %vm1244_vm0 = vcmask 982016  }
  0x74   : > { %s2104_s27 = sld [smem:[#allocation3 + $0x2]]  ;;  %v2119_v9 = vld [vmem:[%s2092_s11 + $0x30] sm:$0xff]  ;;  %v2122_v10 = vld [vmem:[%s2092_s11 + $0x38] sm:$0xff]  ;;  %s2126_s23 = sld [smem:[#allocation3 + $0x3]] }
  0x75   : > { %s2128_s24 = sld [smem:[#allocation7]]  ;;  %s2132_s6 = sld [smem:[#allocation7 + $0x1]] }
  0x76   : > { %s2134_s8 = sld [smem:[#allocation7 + $0x2]]  ;;  %s2140_s26 = sld [smem:[#allocation7 + $0x3]] }
  0x77   : > { %s2158_s9 = sld [smem:[#allocation3 + $0x4]]  ;;  %s2189_s10 = sld [smem:[#allocation3 + $0x5]] }
  0x78   : > { %s269_s14 = smax.f32 %s1914_s13, %s268_s12  ;;  %s2200_s7 = sld [smem:[#allocation7 + $0x4]] }
  0x79   : > { %s270_s15 = smul.f32 %s269_s14, %s269_s14  ;;  %v307_v3 = vstv %s275_s16  ;;  %v350_v13 = vstv %s1385_s21  ;;  %s2208_s12 = sld [smem:[#allocation7 + $0x5]] }
  0x7a   : > { %v308_v11 = vsub.f32 %v2099_v2, %v307_v3  ;;  %v309_v12 = vsub.f32 %v2102_v4, %v307_v3  ;;  %v310_v14 = vsub.f32 %v2107_v5, %v307_v3  ;;  %v311_v15 = vsub.f32 %v2110_v6, %v307_v3  ;;  %s2225_s13 = sld [smem:[#allocation3 + $0x6]]  ;;  %s2254_s14 = sld [smem:[#allocation3 + $0x7]] }
  0x7b   : > { %v271_v0 = vstv %s270_s15  ;;  %v312_v16 = vsub.f32 %v2113_v7, %v307_v3  ;;  %v313_v17 = vsub.f32 %v2116_v8, %v307_v3  ;;  %v314_v18 = vsub.f32 %v2119_v9, %v307_v3  ;;  %s2264_s15 = sld [smem:[#allocation7 + $0x6]]  ;;  %s2266_s16 = sld [smem:[#allocation7 + $0x7]] }
  0x7c   : > { %1493 = vrcp.f32 %v271_v0  ;;  %v315_v19 = vsub.f32 %v2122_v10, %v307_v3  ;;  %v2142_v20 = vmul.f32 %v308_v11, %v308_v11  ;;  %v351_v21 = vsub.f32 %v2099_v2, %v350_v13  ;;  %s2289_s21 = sld [smem:[#allocation3 + $0x8]]  ;;  %p3644_p2 = scmp.ne.s32.totalorder %s3421_s28, 0 }
  0x7d   : > { %v352_v22 = vsub.f32 %v2102_v4, %v350_v13  ;;  %v353_v23 = vsub.f32 %v2107_v5, %v350_v13  ;;  %v2147_v24 = vmul.f32 %v309_v12, %v309_v12  ;;  %v354_v25 = vsub.f32 %v2110_v6, %v350_v13 }
  0x7e   : > { %v355_v26 = vsub.f32 %v2113_v7, %v350_v13  ;;  %v356_v27 = vsub.f32 %v2116_v8, %v350_v13  ;;  %v2152_v28 = vmul.f32 %v310_v14, %v310_v14  ;;  %v2154_v29 = vmul.f32 %v311_v15, %v311_v15 }
  0x7f   : > { %v357_v30 = vsub.f32 %v2119_v9, %v350_v13  ;;  %v408_v31 = vstv %s2104_s27  ;;  %v2160_v32 = vmul.f32 %v312_v16, %v312_v16  ;;  %v2162_v33 = vmul.f32 %v313_v17, %v313_v17  ;;  %s2318_s27 = sld [smem:[#allocation3 + $0x9]] }
  0x80   : > { %v2164_v34 = vmul.f32 %v314_v18, %v314_v18  ;;  %v358_v35 = vsub.f32 %v2122_v10, %v350_v13  ;;  %v2167_v36 = vmul.f32 %v315_v19, %v315_v19  ;;  %v2169_v37 = vmul.f32 %v351_v21, %v351_v21 }
  0x81   : > { %v2171_v38 = vmul.f32 %v352_v22, %v352_v22  ;;  %v2173_v39 = vmul.f32 %v353_v23, %v353_v23  ;;  %v2175_v40 = vmul.f32 %v354_v25, %v354_v25  ;;  %v2177_v41 = vmul.f32 %v355_v26, %v355_v26 }
  0x82   : > { %v2179_v42 = vmul.f32 %v356_v27, %v356_v27  ;;  %v409_v43 = vsub.f32 %v2099_v2, %v408_v31  ;;  %v2183_v44 = vstv %s2128_s24  ;;  %v2185_v45 = vmul.f32 %v357_v30, %v357_v30  ;;  %s2336_s24 = sld [smem:[#allocation7 + $0x9]] }
  0x83   : > { %3432 = vst [vmem:[#allocation15_spill] sm:$0xff] %v2183_v44  ;;  %v410_v46 = vsub.f32 %v2102_v4, %v408_v31  ;;  %v466_v47 = vstv %s2126_s23  ;;  %v2191_v48 = vmul.f32 %v358_v35, %v358_v35  ;;  %v2194_v49 = vstv %s2132_s6  ;;  %s2334_s23 = sld [smem:[#allocation7 + $0x8]]  ;;  %s2360_s6 = sld [smem:[#allocation3 + $0xa]] }
  0x84   : > { %3433 = vst [vmem:[#allocation16_spill] sm:$0xff] %v2194_v49  ;;  %v411_v50 = vsub.f32 %v2107_v5, %v408_v31  ;;  %v2198_v51 = vstv %s2134_s8  ;;  %v412_v52 = vsub.f32 %v2110_v6, %v408_v31  ;;  %v413_v53 = vsub.f32 %v2113_v7, %v408_v31  ;;  %s2383_s8 = sld [smem:[#allocation3 + $0xb]] }
  0x85   : > { %3434 = vst [vmem:[#allocation17_spill] sm:$0xff] %v2198_v51  ;;  %v414_v54 = vsub.f32 %v2116_v8, %v408_v31  ;;  %v2206_v55 = vstv %s2140_s26  ;;  %v415_v56 = vsub.f32 %v2119_v9, %v408_v31  ;;  %v416_v57 = vsub.f32 %v2122_v10, %v408_v31  ;;  %s2403_s26 = sld [smem:[#allocation3 + $0xc]] }
  0x86   : > { %v1494_v1 = vpop.eup %1493  ;;  %3435 = vst [vmem:[#allocation18_spill] sm:$0xff] %v2206_v55  ;;  %v2212_v58 = vmul.f32 %v409_v43, %v409_v43  ;;  %v467_v59 = vsub.f32 %v2099_v2, %v466_v47  ;;  %v2215_v60 = vmul.f32 %v410_v46, %v410_v46  ;;  %v468_v61 = vsub.f32 %v2102_v4, %v466_v47 }
  0x87   : > { %1426 = vpush %v1494_v1  ;;  %v469_v62 = vsub.f32 %v2107_v5, %v466_v47  ;;  %v470_v63 = vsub.f32 %v2110_v6, %v466_v47  ;;  %v2220_v0 = vmul.f32 %v411_v50, %v411_v50  ;;  %v471_v1 = vsub.f32 %v2113_v7, %v466_v47 }
  0x88   : > { %v472_v3 = vsub.f32 %v2116_v8, %v466_v47  ;;  %v524_v11 = vstv %s2158_s9  ;;  %v2227_v12 = vmul.f32 %v412_v52, %v412_v52  ;;  %v2229_v13 = vmul.f32 %v413_v53, %v413_v53  ;;  %s2405_s9 = sld [smem:[#allocation7 + $0xa]] }
  0x89   : > { %v473_v14 = vsub.f32 %v2119_v9, %v466_v47  ;;  %v474_v15 = vsub.f32 %v2122_v10, %v466_v47  ;;  %v2233_v16 = vmul.f32 %v414_v54, %v414_v54  ;;  %v2235_v17 = vmul.f32 %v415_v56, %v415_v56 }
  0x8a   : > { %v2237_v18 = vmul.f32 %v416_v57, %v416_v57  ;;  %v2239_v19 = vmul.f32 %v467_v59, %v467_v59  ;;  %v2241_v21 = vmul.f32 %v468_v61, %v468_v61  ;;  %v2243_v22 = vmul.f32 %v469_v62, %v469_v62 }
  0x8b   : > { %v2245_v23 = vmul.f32 %v470_v63, %v470_v63  ;;  %v525_v25 = vsub.f32 %v2099_v2, %v524_v11  ;;  %v2248_v26 = vmul.f32 %v471_v1, %v471_v1  ;;  %v2250_v27 = vmul.f32 %v472_v3, %v472_v3 }
  0x8c   : > { %v526_v30 = vsub.f32 %v2102_v4, %v524_v11  ;;  %v582_v31 = vstv %s2189_s10  ;;  %v2256_v35 = vmul.f32 %v473_v14, %v473_v14  ;;  %v2258_v43 = vmul.f32 %v474_v15, %v474_v15  ;;  %s2449_s10 = sld [smem:[#allocation3 + $0xd]] }
  0x8d   : > { %v527_v46 = vsub.f32 %v2107_v5, %v524_v11  ;;  %v2262_v47 = vstv %s2200_s7  ;;  %v528_v50 = vsub.f32 %v2110_v6, %v524_v11  ;;  %v529_v52 = vsub.f32 %v2113_v7, %v524_v11 }
  0x8e   : > { %3436 = vst [vmem:[#allocation19_spill] sm:$0xff] %v2262_v47  ;;  %v530_v53 = vsub.f32 %v2116_v8, %v524_v11  ;;  %v2272_v54 = vstv %s2208_s12  ;;  %v531_v56 = vsub.f32 %v2119_v9, %v524_v11  ;;  %v532_v57 = vsub.f32 %v2122_v10, %v524_v11  ;;  %s2464_s12 = sld [smem:[#allocation7 + $0xb]] }
  0x8f   : > { %3437 = vst [vmem:[#allocation20_spill] sm:$0xff] %v2272_v54  ;;  %v2276_v59 = vmul.f32 %v525_v25, %v525_v25  ;;  %v583_v61 = vsub.f32 %v2099_v2, %v582_v31  ;;  %v2279_v62 = vmul.f32 %v526_v30, %v526_v30  ;;  %v584_v63 = vsub.f32 %v2102_v4, %v582_v31 }
  0x90   : > { %v585_v1 = vsub.f32 %v2107_v5, %v582_v31  ;;  %v586_v3 = vsub.f32 %v2110_v6, %v582_v31  ;;  %v2284_v14 = vmul.f32 %v527_v46, %v527_v46  ;;  %v587_v15 = vsub.f32 %v2113_v7, %v582_v31 }
  0x91   : > { %3438 = vst [vmem:[#allocation21_spill] sm:$0xff] %v2279_v62  ;;  %v588_v54 = vsub.f32 %v2116_v8, %v582_v31  ;;  %v640_v47 = vstv %s2225_s13  ;;  %v2291_v11 = vmul.f32 %v528_v50, %v528_v50  ;;  %v2293_v25 = vmul.f32 %v529_v52, %v529_v52 }
  0x92   : > { %3439 = vst [vmem:[#allocation22_spill] sm:$0xff] %v2284_v14  ;;  %v589_v30 = vsub.f32 %v2119_v9, %v582_v31  ;;  %v590_v55 = vsub.f32 %v2122_v10, %v582_v31  ;;  %v2297_v51 = vmul.f32 %v530_v53, %v530_v53  ;;  %v2299_v46 = vmul.f32 %v531_v56, %v531_v56 }
  0x93   : > { %3440 = vst [vmem:[#allocation23_spill] sm:$0xff] %v2291_v11  ;;  %3441 = vst [vmem:[#allocation24_spill] sm:$0xff] %v2293_v25  ;;  %v2301_v49 = vmul.f32 %v532_v57, %v532_v57  ;;  %v2303_v44 = vmul.f32 %v583_v61, %v583_v61  ;;  %v2305_v14 = vmul.f32 %v584_v63, %v584_v63  ;;  %v698_v56 = vstv %s2254_s14  ;;  %s2493_s14 = sld [smem:[#allocation7 + $0xc]] }
  0x94   : > { %3442 = vst [vmem:[#allocation25_spill] sm:$0xff] %v2297_v51  ;;  %3443 = vst [vmem:[#allocation26_spill] sm:$0xff] %v2299_v46  ;;  %v2307_v50 = vmul.f32 %v585_v1, %v585_v1  ;;  %v2309_v52 = vmul.f32 %v586_v3, %v586_v3  ;;  %v641_v25 = vsub.f32 %v2099_v2, %v640_v47  ;;  %v2325_v63 = vstv %s2264_s15  ;;  %s2506_s15 = sld [smem:[#allocation3 + $0xe]] }
  0x95   : > { %3444 = vst [vmem:[#allocation27_spill] sm:$0xff] %v2301_v49  ;;  %3445 = vst [vmem:[#allocation28_spill] sm:$0xff] %v2303_v44  ;;  %v2312_v11 = vmul.f32 %v587_v15, %v587_v15  ;;  %v2314_v31 = vmul.f32 %v588_v54, %v588_v54  ;;  %v642_v53 = vsub.f32 %v2102_v4, %v640_v47  ;;  %v2328_v1 = vstv %s2266_s16  ;;  %s3086_s16 = sld [smem:[#allocation3 + $0xf]] }
  0x96   : > { %3446 = vst [vmem:[#allocation29_spill] sm:$0xff] %v2305_v14  ;;  %3447 = vst [vmem:[#allocation30_spill] sm:$0xff] %v2307_v50  ;;  %v2320_v57 = vmul.f32 %v589_v30, %v589_v30  ;;  %v2322_v61 = vmul.f32 %v590_v55, %v590_v55  ;;  %v643_v3 = vsub.f32 %v2107_v5, %v640_v47  ;;  %v756_v49 = vstv %s2289_s21  ;;  %s3250_s21 = sld [smem:[#allocation7 + $0xe]] }
  0x97   : > { %3448 = vst [vmem:[#allocation31_spill] sm:$0xff] %v2309_v52  ;;  %3449 = vst [vmem:[#allocation32_spill] sm:$0xff] %v2312_v11  ;;  %v644_v15 = vsub.f32 %v2110_v6, %v640_v47  ;;  %v645_v54 = vsub.f32 %v2113_v7, %v640_v47  ;;  %v647_v55 = vsub.f32 %v2119_v9, %v640_v47 }
  0x98   : > { %3450 = vst [vmem:[#allocation33_spill] sm:$0xff] %v2314_v31  ;;  %3451 = vst [vmem:[#allocation34_spill] sm:$0xff] %v2320_v57  ;;  %v646_v31 = vsub.f32 %v2116_v8, %v640_v47  ;;  %v648_v30 = vsub.f32 %v2122_v10, %v640_v47  ;;  %v700_v57 = vsub.f32 %v2102_v4, %v698_v56 }
  0x99   : > { %3452 = vst [vmem:[#allocation35_spill] sm:$0xff] %v2322_v61  ;;  %3453 = vst [vmem:[#allocation36_spill] sm:$0xff] %v2325_v63  ;;  %v2340_v63 = vmul.f32 %v641_v25, %v641_v25  ;;  %v2343_v61 = vmul.f32 %v642_v53, %v642_v53  ;;  %v701_v11 = vsub.f32 %v2107_v5, %v698_v56 }
  0x9a   : > { %3454 = vst [vmem:[#allocation37_spill] sm:$0xff] %v2328_v1  ;;  %v699_v1 = vsub.f32 %v2099_v2, %v698_v56  ;;  %v702_v52 = vsub.f32 %v2110_v6, %v698_v56  ;;  %v703_v50 = vsub.f32 %v2113_v7, %v698_v56  ;;  %v704_v14 = vsub.f32 %v2116_v8, %v698_v56 }
  0x9b   : > { %3455 = vst [vmem:[#allocation38_spill] sm:$0xff] %v2340_v63  ;;  %3456 = vst [vmem:[#allocation39_spill] sm:$0xff] %v2343_v61  ;;  %v705_v44 = vsub.f32 %v2119_v9, %v698_v56  ;;  %v2352_v47 = vmul.f32 %v643_v3, %v643_v3  ;;  %v2354_v25 = vmul.f32 %v644_v15, %v644_v15 }
  0x9c   : > { %v2356_v53 = vmul.f32 %v645_v54, %v645_v54  ;;  %v2358_v61 = vmul.f32 %v646_v31, %v646_v31  ;;  %v2362_v63 = vmul.f32 %v647_v55, %v647_v55  ;;  %v2364_v46 = vmul.f32 %v648_v30, %v648_v30 }
  0x9d   : > { %3457 = vst [vmem:[#allocation40_spill] sm:$0xff] %v2352_v47  ;;  %3458 = vst [vmem:[#allocation41_spill] sm:$0xff] %v2354_v25  ;;  %v706_v51 = vsub.f32 %v2122_v10, %v698_v56  ;;  %v2367_v62 = vmul.f32 %v699_v1, %v699_v1  ;;  %v2369_v3 = vmul.f32 %v700_v57, %v700_v57 }
  0x9e   : > { %3459 = vst [vmem:[#allocation42_spill] sm:$0xff] %v2356_v53  ;;  %3460 = vst [vmem:[#allocation43_spill] sm:$0xff] %v2358_v61  ;;  %v2371_v15 = vmul.f32 %v701_v11, %v701_v11  ;;  %v2373_v54 = vmul.f32 %v702_v52, %v702_v52  ;;  %v757_v31 = vsub.f32 %v2099_v2, %v756_v49  ;;  %v872_v53 = vstv %s2360_s6 }
  0x9f   : > { %3461 = vst [vmem:[#allocation44_spill] sm:$0xff] %v2362_v63  ;;  %3462 = vst [vmem:[#allocation45_spill] sm:$0xff] %v2364_v46  ;;  %v2376_v61 = vmul.f32 %v703_v50, %v703_v50  ;;  %v2378_v55 = vmul.f32 %v704_v14, %v704_v14  ;;  %v2380_v30 = vmul.f32 %v705_v44, %v705_v44  ;;  %v814_v46 = vstv %s2318_s27  ;;  %s3278_s27 = sld [smem:[#allocation7 + $0xf]] }
  0xa0   : > { %3463 = vst [vmem:[#allocation46_spill] sm:$0xff] %v2367_v62  ;;  %3464 = vst [vmem:[#allocation47_spill] sm:$0xff] %v2369_v3  ;;  %v758_v56 = vsub.f32 %v2102_v4, %v756_v49  ;;  %v759_v57 = vsub.f32 %v2107_v5, %v756_v49  ;;  %v760_v11 = vsub.f32 %v2110_v6, %v756_v49  ;;  %v2396_v14 = vstv %s2336_s24  ;;  %s1416_s24 = sshll.u32 (%p3644_p2), %s1967_s2, 3 }
  0xa1   : > { %3465 = vst [vmem:[#allocation48_spill] sm:$0xff] %v2371_v15  ;;  %3466 = vst [vmem:[#allocation49_spill] sm:$0xff] %v2373_v54  ;;  %v761_v52 = vsub.f32 %v2113_v7, %v756_v49  ;;  %v2389_v1 = vmul.f32 %v706_v51, %v706_v51  ;;  %v762_v50 = vsub.f32 %v2116_v8, %v756_v49  ;;  %s1262_s6 = ssub.s32 (%p3644_p2), 25, %s1416_s24 }
  0xa2   : > { %3467 = vst [vmem:[#allocation50_spill] sm:$0xff] %v2376_v61  ;;  %3468 = vst [vmem:[#allocation51_spill] sm:$0xff] %v2378_v55  ;;  %v2393_v61 = vstv %s2334_s23  ;;  %v763_v44 = vsub.f32 %v2119_v9, %v756_v49  ;;  %v2400_v55 = vmul.f32 %v757_v31, %v757_v31  ;;  %v815_v54 = vsub.f32 %v2099_v2, %v814_v46  ;;  %s3315_s23 = scalar_lea.vmem [#allocation10], %s1383_s30  ;;  %s1254_s30 = scalar_lea.sflag [#allocation5], %s2086_s5 }
  0xa3   : > { %3469 = vst [vmem:[#allocation52_spill] sm:$0xff] %v2380_v30  ;;  %3470 = vst [vmem:[#allocation53_spill] sm:$0xff] %v2389_v1  ;;  %v764_v30 = vsub.f32 %v2122_v10, %v756_v49  ;;  %v816_v51 = vsub.f32 %v2102_v4, %v814_v46  ;;  %v817_v1 = vsub.f32 %v2107_v5, %v814_v46  ;;  %p1263_p7 = scmp.lt.s32.totalorder (%p3644_p2), %s1262_s6, 8 }
  0xa4   : > { %3471 = vst [vmem:[#allocation54_spill] sm:$0xff] %v2393_v61  ;;  %3472 = vst [vmem:[#allocation55_spill] sm:$0xff] %v2396_v14  ;;  %v818_v61 = vsub.f32 %v2110_v6, %v814_v46  ;;  %v819_v14 = vsub.f32 %v2113_v7, %v814_v46  ;;  %v2411_v15 = vmul.f32 %v758_v56, %v758_v56 }
  0xa5   : > { %3473 = vst [vmem:[#allocation56_spill] sm:$0xff] %v2400_v55  ;;  %v2413_v49 = vmul.f32 %v759_v57, %v759_v57  ;;  %v2415_v31 = vmul.f32 %v760_v11, %v760_v11  ;;  %v2417_v55 = vmul.f32 %v761_v52, %v761_v52  ;;  %v2419_v3 = vmul.f32 %v762_v50, %v762_v50 }
  0xa6   : > { %3474 = vst [vmem:[#allocation57_spill] sm:$0xff] %v2411_v15  ;;  %v820_v62 = vsub.f32 %v2116_v8, %v814_v46  ;;  %v821_v63 = vsub.f32 %v2119_v9, %v814_v46  ;;  %v2424_v25 = vmul.f32 %v763_v44, %v763_v44  ;;  %v2426_v47 = vmul.f32 %v764_v30, %v764_v30 }
  0xa7   : > { %3475 = vst [vmem:[#allocation58_spill] sm:$0xff] %v2413_v49  ;;  %3476 = vst [vmem:[#allocation59_spill] sm:$0xff] %v2415_v31  ;;  %v822_v56 = vsub.f32 %v2122_v10, %v814_v46  ;;  %v2429_v57 = vmul.f32 %v815_v54, %v815_v54  ;;  %v2431_v11 = vmul.f32 %v816_v51, %v816_v51 }
  0xa8   : > { %3477 = vst [vmem:[#allocation60_spill] sm:$0xff] %v2417_v55  ;;  %3478 = vst [vmem:[#allocation61_spill] sm:$0xff] %v2419_v3  ;;  %v2433_v52 = vmul.f32 %v817_v1, %v817_v1  ;;  %v2435_v50 = vmul.f32 %v818_v61, %v818_v61  ;;  %v2437_v3 = vmul.f32 %v819_v14, %v819_v14 }
  0xa9   : > { %3479 = vst [vmem:[#allocation62_spill] sm:$0xff] %v2424_v25  ;;  %3480 = vst [vmem:[#allocation63_spill] sm:$0xff] %v2426_v47  ;;  %v873_v55 = vsub.f32 %v2099_v2, %v872_v53  ;;  %v874_v44 = vsub.f32 %v2102_v4, %v872_v53  ;;  %v875_v30 = vsub.f32 %v2107_v5, %v872_v53  ;;  %v930_v47 = vstv %s2383_s8 }
  0xaa   : > { %3481 = vst [vmem:[#allocation64_spill] sm:$0xff] %v2429_v57  ;;  %3482 = vst [vmem:[#allocation65_spill] sm:$0xff] %v2431_v11  ;;  %v2443_v46 = vmul.f32 %v820_v62, %v820_v62  ;;  %v2445_v54 = vmul.f32 %v821_v63, %v821_v63  ;;  %v876_v1 = vsub.f32 %v2110_v6, %v872_v53 }
  0xab   : > { %3483 = vst [vmem:[#allocation66_spill] sm:$0xff] %v2433_v52  ;;  %3484 = vst [vmem:[#allocation67_spill] sm:$0xff] %v2435_v50  ;;  %v877_v51 = vsub.f32 %v2113_v7, %v872_v53  ;;  %v2451_v61 = vmul.f32 %v822_v56, %v822_v56  ;;  %v878_v14 = vsub.f32 %v2116_v8, %v872_v53  ;;  %v2457_v52 = vstv %s2405_s9 }
  0xac   : > { %3485 = vst [vmem:[#allocation68_spill] sm:$0xff] %v2437_v3  ;;  %3486 = vst [vmem:[#allocation69_spill] sm:$0xff] %v2443_v46  ;;  %v879_v3 = vsub.f32 %v2119_v9, %v872_v53  ;;  %v880_v50 = vsub.f32 %v2122_v10, %v872_v53  ;;  %v931_v62 = vsub.f32 %v2099_v2, %v930_v47 }
  0xad   : > { %3487 = vst [vmem:[#allocation70_spill] sm:$0xff] %v2445_v54  ;;  %3488 = vst [vmem:[#allocation71_spill] sm:$0xff] %v2451_v61  ;;  %v932_v63 = vsub.f32 %v2102_v4, %v930_v47  ;;  %v988_v54 = vstv %s2403_s26  ;;  %v2466_v56 = vmul.f32 %v873_v55, %v873_v55  ;;  %v2468_v61 = vmul.f32 %v874_v44, %v874_v44 }
  0xae   : > { %3489 = vst [vmem:[#allocation72_spill] sm:$0xff] %v2457_v52  ;;  %v2470_v46 = vmul.f32 %v875_v30, %v875_v30  ;;  %v933_v53 = vsub.f32 %v2107_v5, %v930_v47  ;;  %v2473_v11 = vmul.f32 %v876_v1, %v876_v1  ;;  %v2475_v52 = vmul.f32 %v877_v51, %v877_v51 }
  0xaf   : > { %3490 = vst [vmem:[#allocation73_spill] sm:$0xff] %v2466_v56  ;;  %3491 = vst [vmem:[#allocation74_spill] sm:$0xff] %v2468_v61  ;;  %v934_v57 = vsub.f32 %v2110_v6, %v930_v47  ;;  %v935_v25 = vsub.f32 %v2113_v7, %v930_v47  ;;  %v2479_v31 = vmul.f32 %v878_v14, %v878_v14 }
  0xb0   : > { %3492 = vst [vmem:[#allocation75_spill] sm:$0xff] %v2470_v46  ;;  %3493 = vst [vmem:[#allocation76_spill] sm:$0xff] %v2473_v11  ;;  %v2481_v49 = vmul.f32 %v879_v3, %v879_v3  ;;  %v2483_v55 = vmul.f32 %v880_v50, %v880_v50  ;;  %v936_v44 = vsub.f32 %v2116_v8, %v930_v47 }
  0xb1   : > { %3494 = vst [vmem:[#allocation77_spill] sm:$0xff] %v2475_v52  ;;  %3495 = vst [vmem:[#allocation78_spill] sm:$0xff] %v2479_v31  ;;  %v937_v30 = vsub.f32 %v2119_v9, %v930_v47  ;;  %v938_v1 = vsub.f32 %v2122_v10, %v930_v47  ;;  %v2489_v51 = vmul.f32 %v931_v62, %v931_v62 }
  0xb2   : > { %3496 = vst [vmem:[#allocation79_spill] sm:$0xff] %v2481_v49  ;;  %3497 = vst [vmem:[#allocation80_spill] sm:$0xff] %v2483_v55  ;;  %v2491_v52 = vmul.f32 %v932_v63, %v932_v63  ;;  %v2495_v14 = vmul.f32 %v933_v53, %v933_v53  ;;  %v989_v3 = vsub.f32 %v2099_v2, %v988_v54 }
  0xb3   : > { %3498 = vst [vmem:[#allocation81_spill] sm:$0xff] %v2489_v51  ;;  %v990_v50 = vsub.f32 %v2102_v4, %v988_v54  ;;  %v991_v55 = vsub.f32 %v2107_v5, %v988_v54  ;;  %v2500_v49 = vmul.f32 %v934_v57, %v934_v57  ;;  %v2502_v31 = vmul.f32 %v935_v25, %v935_v25 }
  0xb4   : > { %3499 = vst [vmem:[#allocation82_spill] sm:$0xff] %v2491_v52  ;;  %3500 = vst [vmem:[#allocation83_spill] sm:$0xff] %v2495_v14  ;;  %v992_v47 = vsub.f32 %v2110_v6, %v988_v54  ;;  %v993_v62 = vsub.f32 %v2113_v7, %v988_v54  ;;  %v2508_v63 = vmul.f32 %v936_v44, %v936_v44  ;;  %v1046_v52 = vstv %s2449_s10 }
  0xb5   : > { %3501 = vst [vmem:[#allocation84_spill] sm:$0xff] %v2500_v49  ;;  %3502 = vst [vmem:[#allocation85_spill] sm:$0xff] %v2502_v31  ;;  %v994_v53 = vsub.f32 %v2116_v8, %v988_v54  ;;  %v995_v14 = vsub.f32 %v2119_v9, %v988_v54  ;;  %v2515_v11 = vmul.f32 %v937_v30, %v937_v30  ;;  %v2521_v31 = vstv %s2464_s12 }
  0xb6   : > { %3503 = vst [vmem:[#allocation86_spill] sm:$0xff] %v2508_v63  ;;  %v2517_v57 = vmul.f32 %v938_v1, %v938_v1  ;;  %v996_v25 = vsub.f32 %v2122_v10, %v988_v54  ;;  %3506 = vst [vmem:[#allocation89_spill] sm:$0xff] %v2521_v31  ;;  %v2523_v49 = vmul.f32 %v989_v3, %v989_v3 }
  0xb7   : > { %3504 = vst [vmem:[#allocation87_spill] sm:$0xff] %v2515_v11  ;;  %v2525_v44 = vmul.f32 %v990_v50, %v990_v50  ;;  %v2527_v63 = vmul.f32 %v991_v55, %v991_v55  ;;  %v2529_v46 = vmul.f32 %v992_v47, %v992_v47  ;;  %v2531_v61 = vmul.f32 %v993_v62, %v993_v62  ;;  %v3556_v11 = vld [vmem:[#allocation44_spill] sm:$0xff] }
  0xb8   : > { %s2462_s7 = spop %1426  ;;  %3505 = vst [vmem:[#allocation88_spill] sm:$0xff] %v2517_v57  ;;  %3507 = vst [vmem:[#allocation90_spill] sm:$0xff] %v2523_v49  ;;  %v1047_v30 = vsub.f32 %v2099_v2, %v1046_v52  ;;  %v1048_v1 = vsub.f32 %v2102_v4, %v1046_v52  ;;  %v2537_v57 = vmul.f32 %v994_v53, %v994_v53  ;;  %v3555_v49 = vld [vmem:[#allocation16_spill] sm:$0xff] }
  0xb9   : > { %s274_s13 = smul.f32 -1.442695, %s2462_s7  ;;  %3508 = vst [vmem:[#allocation91_spill] sm:$0xff] %v2525_v44  ;;  %3509 = vst [vmem:[#allocation92_spill] sm:$0xff] %v2527_v63  ;;  %v2539_v3 = vmul.f32 %v995_v14, %v995_v14  ;;  %v1049_v50 = vsub.f32 %v2107_v5, %v1046_v52  ;;  %v2544_v47 = vmul.f32 %v996_v25, %v996_v25  ;;  %v3553_v63 = vld [vmem:[#allocation43_spill] sm:$0xff] }
  0xba   : > { %3510 = vst [vmem:[#allocation93_spill] sm:$0xff] %v2529_v46  ;;  %3511 = vst [vmem:[#allocation94_spill] sm:$0xff] %v2531_v61  ;;  %v1050_v62 = vsub.f32 %v2110_v6, %v1046_v52  ;;  %v1051_v31 = vsub.f32 %v2113_v7, %v1046_v52  ;;  %v1052_v14 = vsub.f32 %v2116_v8, %v1046_v52 }
  0xbb   : > { %v2513_v51 = vstv %s274_s13  ;;  %3512 = vst [vmem:[#allocation95_spill] sm:$0xff] %v2537_v57  ;;  %3513 = vst [vmem:[#allocation96_spill] sm:$0xff] %v2539_v3  ;;  %v1053_v53 = vsub.f32 %v2119_v9, %v1046_v52  ;;  %v2558_v25 = vmul.f32 %v1047_v30, %v1047_v30  ;;  %v2564_v7 = vmul.f32 %v1049_v50, %v1049_v50 }
  0xbc   : > { %v325_v54 = vmul.f32 %v2513_v51, %v2142_v20  ;;  %v326_v55 = vmul.f32 %v2513_v51, %v2147_v24  ;;  %3514 = vst [vmem:[#allocation97_spill] sm:$0xff] %v2544_v47  ;;  %v327_v61 = vmul.f32 %v2513_v51, %v2152_v28  ;;  %v2551_v20 = vstv %s2493_s14 }
  0xbd   : > { %3515 = vst [vmem:[#allocation98_spill] sm:$0xff] %v2551_v20  ;;  %v328_v3 = vmul.f32 %v2513_v51, %v2154_v29  ;;  %v1054_v24 = vsub.f32 %v2122_v10, %v1046_v52  ;;  %3516 = vst [vmem:[#allocation99_spill] sm:$0xff] %v2558_v25  ;;  %v2560_v47 = vmul.f32 %v1048_v1, %v1048_v1  ;;  %v2567_v28 = vstv %s2506_s15  ;;  %v3549_v25 = vld [vmem:[#allocation41_spill] sm:$0xff] }
  0xbe   : > { %v329_v6 = vmul.f32 %v2513_v51, %v2160_v32  ;;  %1495 = vpow2.f32 %v325_v54  ;;  %3518 = vst [vmem:[#allocation101_spill] sm:$0xff] %v2564_v7  ;;  %3519 = vst [vmem:[#allocation102_spill] sm:$0xff] %v2567_v28  ;;  %v330_v8 = vmul.f32 %v2513_v51, %v2162_v33  ;;  %v2571_v9 = vmul.f32 %v1050_v62, %v1050_v62  ;;  %v3529_v62 = vld [vmem:[#allocation22_spill] sm:$0xff] }
  0xbf   : > { %3517 = vst [vmem:[#allocation100_spill] sm:$0xff] %v2560_v47  ;;  %1497 = vpow2.f32 %v326_v55  ;;  %v2573_v29 = vmul.f32 %v1051_v31, %v1051_v31  ;;  %v331_v10 = vmul.f32 %v2513_v51, %v2164_v34  ;;  %v2577_v52 = vmul.f32 %v1052_v14, %v1052_v14 }
  0xc0   : > { %3520 = vst [vmem:[#allocation103_spill] sm:$0xff] %v2571_v9  ;;  %1499 = vpow2.f32 %v327_v61  ;;  %v2579_v32 = vmul.f32 %v1053_v53, %v1053_v53  ;;  %v332_v30 = vmul.f32 %v2513_v51, %v2167_v36  ;;  %v2583_v1 = vmul.f32 %v1054_v24, %v1054_v24  ;;  %v3545_v9 = vld [vmem:[#allocation39_spill] sm:$0xff] }
  0xc1   : > { %3521 = vst [vmem:[#allocation104_spill] sm:$0xff] %v2573_v29  ;;  %3522 = vst [vmem:[#allocation105_spill] sm:$0xff] %v2577_v52  ;;  %1501 = vpow2.f32 %v328_v3  ;;  %v2587_v33 = vsub.f32 %v2099_v2, %v2567_v28  ;;  %v367_v31 = vmul.f32 %v2169_v37, %v2513_v51  ;;  %v2593_v34 = vsub.f32 %v2102_v4, %v2567_v28 }
  0xc2   : > { %3523 = vst [vmem:[#allocation106_spill] sm:$0xff] %v2579_v32  ;;  %3524 = vst [vmem:[#allocation107_spill] sm:$0xff] %v2583_v1  ;;  %1503 = vpow2.f32 %v329_v6  ;;  %v2597_v61 = vsub.f32 %v2107_v5, %v2567_v28  ;;  %v368_v36 = vmul.f32 %v2171_v38, %v2513_v51  ;;  %v369_v2 = vmul.f32 %v2173_v39, %v2513_v51  ;;  %v3532_v6 = vld [vmem:[#allocation25_spill] sm:$0xff]  ;;  %v3540_v1 = vld [vmem:[#allocation32_spill] sm:$0xff] }
  0xc3   : > { %3525 = vst [vmem:[#allocation108_spill] sm:$0xff] %v2587_v33  ;;  %3526 = vst [vmem:[#allocation109_spill] sm:$0xff] %v2593_v34  ;;  %1505 = vpow2.f32 %v330_v8  ;;  %v370_v54 = vmul.f32 %v2175_v40, %v2513_v51  ;;  %v371_v37 = vmul.f32 %v2177_v41, %v2513_v51  ;;  %v372_v4 = vmul.f32 %v2179_v42, %v2513_v51  ;;  %v3543_v33 = vld [vmem:[#allocation35_spill] sm:$0xff] }
  0xc4   : > { %3527 = vst [vmem:[#allocation110_spill] sm:$0xff] %v2597_v61  ;;  %1507 = vpow2.f32 %v331_v10  ;;  %v373_v5 = vmul.f32 %v2185_v45, %v2513_v51  ;;  %v374_v38 = vmul.f32 %v2191_v48, %v2513_v51  ;;  %v425_v39 = vmul.f32 %v2212_v58, %v2513_v51  ;;  %v3533_v10 = vld [vmem:[#allocation26_spill] sm:$0xff] }
  0xc5   : > { %1509 = vpow2.f32 %v332_v30  ;;  %v426_v40 = vmul.f32 %v2215_v60, %v2513_v51  ;;  %v427_v41 = vmul.f32 %v2220_v0, %v2513_v51  ;;  %v428_v42 = vmul.f32 %v2227_v12, %v2513_v51 }
  0xc6   : > { %1511 = vpow2.f32 %v367_v31  ;;  %v429_v45 = vmul.f32 %v2229_v13, %v2513_v51  ;;  %v2625_v48 = vmul.f32 %v2233_v16, %v2513_v51  ;;  %v2629_v58 = vmul.f32 %v2235_v17, %v2513_v51 }
  0xc7   : > { %1513 = vpow2.f32 %v368_v36  ;;  %v2633_v60 = vmul.f32 %v2237_v18, %v2513_v51  ;;  %v2639_v12 = vmul.f32 %v2239_v19, %v2513_v51  ;;  %v2643_v13 = vmul.f32 %v2241_v21, %v2513_v51  ;;  %v3534_v36 = vld [vmem:[#allocation15_spill] sm:$0xff] }
  0xc8   : > { %v2635_v0 = vpop.eup %1495  ;;  %1515 = vpow2.f32 %v369_v2  ;;  %v2647_v16 = vmul.f32 %v2243_v22, %v2513_v51  ;;  %v2653_v18 = vmul.f32 %v2245_v23, %v2513_v51  ;;  %v2657_v3 = vmul.f32 %v2248_v26, %v2513_v51 }
  0xc9   : > { %v2649_v17 = vpop.eup %1497  ;;  %1517 = vpow2.f32 %v370_v54  ;;  %v2661_v19 = vmul.f32 %v2250_v27, %v2513_v51  ;;  %v2667_v22 = vmul.f32 %v2256_v35, %v2513_v51  ;;  %v2671_v50 = vmul.f32 %v2258_v43, %v2513_v51  ;;  %v3528_v27 = vld [vmem:[#allocation21_spill] sm:$0xff]  ;;  %v3530_v35 = vld [vmem:[#allocation23_spill] sm:$0xff] }
  0xca   : > { %v2663_v21 = vpop.eup %1499  ;;  %1519 = vpow2.f32 %v371_v37  ;;  %v2675_v23 = vmul.f32 %v2276_v59, %v2513_v51  ;;  %v2681_v55 = vmul.f32 %v3528_v27, %v2513_v51  ;;  %v2685_v14 = vmul.f32 %v3529_v62, %v2513_v51  ;;  %v3531_v59 = vld [vmem:[#allocation24_spill] sm:$0xff]  ;;  %v3535_v54 = vld [vmem:[#allocation27_spill] sm:$0xff] }
  0xcb   : > { %v2677_v26 = vpop.eup %1501  ;;  %1521 = vpow2.f32 %v372_v4  ;;  %v2689_v53 = vmul.f32 %v3530_v35, %v2513_v51  ;;  %v2695_v24 = vmul.f32 %v3531_v59, %v2513_v51  ;;  %v2699_v8 = vmul.f32 %v3532_v6, %v2513_v51  ;;  %v3536_v4 = vld [vmem:[#allocation28_spill] sm:$0xff]  ;;  %v3537_v35 = vld [vmem:[#allocation29_spill] sm:$0xff]  ;;  %v3538_v6 = vld [vmem:[#allocation30_spill] sm:$0xff] }
  0xcc   : > { %v2691_v43 = vpop.eup %1503  ;;  %1523 = vpow2.f32 %v373_v5  ;;  %v2703_v30 = vmul.f32 %v3533_v10, %v2513_v51  ;;  %v342_v2 = vmul.f32 %v2635_v0, %v3534_v36  ;;  %v2711_v37 = vmul.f32 %v3535_v54, %v2513_v51  ;;  %v3539_v10 = vld [vmem:[#allocation31_spill] sm:$0xff] }
  0xcd   : > { %v2705_v31 = vpop.eup %1505  ;;  %1525 = vpow2.f32 %v374_v38  ;;  %v2715_v5 = vmul.f32 %v3536_v4, %v2513_v51  ;;  %v343_v62 = vmul.f32 %v2649_v17, %v3534_v36  ;;  %v2723_v59 = vmul.f32 %v3537_v35, %v2513_v51  ;;  %v3541_v35 = vld [vmem:[#allocation33_spill] sm:$0xff] }
  0xce   : > { %v2717_v27 = vpop.eup %1507  ;;  %v2727_v38 = vmul.f32 %v3538_v6, %v2513_v51  ;;  %v2731_v54 = vmul.f32 %v3539_v10, %v2513_v51  ;;  %v344_v4 = vmul.f32 %v2663_v21, %v3534_v36  ;;  %1527 = vpow2.f32 %v425_v39  ;;  %v3542_v10 = vld [vmem:[#allocation34_spill] sm:$0xff] }
  0xcf   : > { %v2733_v20 = vpop.eup %1509  ;;  %v2739_v61 = vmul.f32 %v3540_v1, %v2513_v51  ;;  %v2743_v32 = vmul.f32 %v3541_v35, %v2513_v51  ;;  %v345_v34 = vmul.f32 %v2677_v26, %v3534_v36  ;;  %1529 = vpow2.f32 %v426_v40  ;;  %v3544_v35 = vld [vmem:[#allocation38_spill] sm:$0xff] }
  0xd0   : > { %v1512_v6 = vpop.eup %1511  ;;  %v2749_v52 = vmul.f32 %v3542_v10, %v2513_v51  ;;  %v2753_v39 = vmul.f32 %v3543_v33, %v2513_v51  ;;  %v346_v1 = vmul.f32 %v2691_v43, %v3534_v36  ;;  %1531 = vpow2.f32 %v427_v41  ;;  %v3547_v33 = vld [vmem:[#allocation40_spill] sm:$0xff] }
  0xd1   : > { %v1514_v28 = vpop.eup %1513  ;;  %v2759_v29 = vmul.f32 %v3544_v35, %v2513_v51  ;;  %v2763_v40 = vmul.f32 %v3545_v9, %v2513_v51  ;;  %v347_v10 = vmul.f32 %v2705_v31, %v3534_v36  ;;  %1533 = vpow2.f32 %v428_v42  ;;  %v3551_v9 = vld [vmem:[#allocation42_spill] sm:$0xff] }
  0xd2   : > { %v1516_v7 = vpop.eup %1515  ;;  %v2769_v47 = vmul.f32 %v3547_v33, %v2513_v51  ;;  %v2773_v41 = vmul.f32 %v3549_v25, %v2513_v51  ;;  %v348_v35 = vmul.f32 %v2717_v27, %v3534_v36  ;;  %1535 = vpow2.f32 %v429_v45 }
  0xd3   : > { %3546 = vst [vmem:[#allocation21_spill] sm:$0xff] %v2763_v40  ;;  %v1518_v57 = vpop.eup %1517  ;;  %v2779_v46 = vmul.f32 %v3551_v9, %v2513_v51  ;;  %v2783_v42 = vmul.f32 %v3553_v63, %v2513_v51  ;;  %v349_v33 = vmul.f32 %v2733_v20, %v3534_v36  ;;  %v384_v25 = vmul.f32 %v1512_v6, %v3555_v49  ;;  %v3558_v63 = vld [vmem:[#allocation45_spill] sm:$0xff] }
  0xd4   : > { %3548 = vst [vmem:[#allocation22_spill] sm:$0xff] %v2769_v47  ;;  %3550 = vst [vmem:[#allocation23_spill] sm:$0xff] %v2773_v41  ;;  %v1520_v44 = vpop.eup %1519  ;;  %1537 = vpow2.f32 %v2625_v48  ;;  %v2791_v56 = vmul.f32 %v3556_v11, %v2513_v51  ;;  %v385_v9 = vmul.f32 %v1514_v28, %v3555_v49  ;;  %v2797_v15 = vmul.f32 %v3558_v63, %v2513_v51  ;;  %v3562_v11 = vld [vmem:[#allocation47_spill] sm:$0xff] }
  0xd5   : > { %3552 = vst [vmem:[#allocation24_spill] sm:$0xff] %v2779_v46  ;;  %3554 = vst [vmem:[#allocation25_spill] sm:$0xff] %v2783_v42  ;;  %v1522_v45 = vpop.eup %1521  ;;  %1539 = vpow2.f32 %v2629_v58  ;;  %v3560_v42 = vld [vmem:[#allocation46_spill] sm:$0xff]  ;;  %v386_v48 = vmul.f32 %v1516_v7, %v3555_v49  ;;  %v400_v41 = vadd.f32 %v1512_v6, %v2635_v0  ;;  %v387_v47 = vmul.f32 %v1518_v57, %v3555_v49 }
  0xd6   : > { %3557 = vst [vmem:[#allocation26_spill] sm:$0xff] %v2791_v56  ;;  %3559 = vst [vmem:[#allocation15_spill] sm:$0xff] %v2797_v15  ;;  %v2801_v36 = vmul.f32 %v3560_v42, %v2513_v51  ;;  %v1524_v46 = vpop.eup %1523  ;;  %1541 = vpow2.f32 %v2633_v60  ;;  %v2808_v56 = vmul.f32 %v3562_v11, %v2513_v51  ;;  %v401_v63 = vadd.f32 %v1514_v28, %v2649_v17  ;;  %v3564_v42 = vld [vmem:[#allocation48_spill] sm:$0xff] }
  0xd7   : > { %v1526_v58 = vpop.eup %1525  ;;  %1543 = vpow2.f32 %v2639_v12  ;;  %v388_v15 = vmul.f32 %v1520_v44, %v3555_v49  ;;  %v389_v0 = vmul.f32 %v1522_v45, %v3555_v49  ;;  %v392_v60 = vadd.f32 %v384_v25, %v342_v2 }
  0xd8   : > { %3561 = vst [vmem:[#allocation27_spill] sm:$0xff] %v2801_v36  ;;  %3563 = vst [vmem:[#allocation28_spill] sm:$0xff] %v2808_v56  ;;  %v2815_v36 = vmul.f32 %v3564_v42, %v2513_v51  ;;  %1545 = vpow2.f32 %v2643_v13  ;;  %v1528_v6 = vpop.eup %1527  ;;  %v390_v11 = vmul.f32 %v1524_v46, %v3555_v49  ;;  %v393_v56 = vadd.f32 %v385_v9, %v343_v62 }
  0xd9   : > { %v402_v40 = vadd.f32 %v1516_v7, %v2663_v21  ;;  %1547 = vpow2.f32 %v2647_v16  ;;  %v1530_v28 = vpop.eup %1529  ;;  %v391_v12 = vmul.f32 %v1526_v58, %v3555_v49  ;;  %v394_v17 = vadd.f32 %v386_v48, %v344_v4 }
  0xda   : > { %3565 = vst [vmem:[#allocation29_spill] sm:$0xff] %v2815_v36  ;;  %v403_v42 = vadd.f32 %v1518_v57, %v2677_v26  ;;  %1549 = vpow2.f32 %v2653_v18  ;;  %v1532_v36 = vpop.eup %1531  ;;  %v395_v2 = vadd.f32 %v387_v47, %v345_v34  ;;  %v404_v13 = vadd.f32 %v1520_v44, %v2691_v43  ;;  %v3566_v18 = vld [vmem:[#allocation17_spill] sm:$0xff] }
  0xdb   : > { %v405_v25 = vadd.f32 %v1522_v45, %v2705_v31  ;;  %1551 = vpow2.f32 %v2657_v3  ;;  %v1534_v62 = vpop.eup %1533  ;;  %v396_v7 = vadd.f32 %v388_v15, %v346_v1  ;;  %v397_v21 = vadd.f32 %v389_v0, %v347_v10 }
  0xdc   : > { %v406_v16 = vadd.f32 %v1524_v46, %v2717_v27  ;;  %1553 = vpow2.f32 %v2661_v19  ;;  %v1536_v49 = vpop.eup %1535  ;;  %v398_v4 = vadd.f32 %v390_v11, %v348_v35  ;;  %v407_v57 = vadd.f32 %v1526_v58, %v2733_v20 }
  0xdd   : > { %v442_v26 = vmul.f32 %v1528_v6, %v3566_v18  ;;  %1555 = vpow2.f32 %v2667_v22  ;;  %v399_v47 = vadd.f32 %v391_v12, %v349_v33  ;;  %v443_v34 = vmul.f32 %v1530_v28, %v3566_v18 }
  0xde   : > { %v1538_v44 = vpop.eup %1537  ;;  %v458_v3 = vadd.f32 %v1528_v6, %v400_v41  ;;  %1557 = vpow2.f32 %v2671_v50  ;;  %v444_v46 = vmul.f32 %v1532_v36, %v3566_v18  ;;  %v459_v19 = vadd.f32 %v1530_v28, %v401_v63  ;;  %v3567_v6 = vld [vmem:[#allocation18_spill] sm:$0xff] }
  0xdf   : > { %v1540_v15 = vpop.eup %1539  ;;  %v450_v43 = vadd.f32 %v442_v26, %v392_v60  ;;  %1559 = vpow2.f32 %v2675_v23  ;;  %v445_v20 = vmul.f32 %v1534_v62, %v3566_v18  ;;  %v451_v27 = vadd.f32 %v443_v34, %v393_v56 }
  0xe0   : > { %v1542_v31 = vpop.eup %1541  ;;  %v460_v1 = vadd.f32 %v1532_v36, %v402_v40  ;;  %1561 = vpow2.f32 %v2681_v55  ;;  %v446_v10 = vmul.f32 %v1536_v49, %v3566_v18  ;;  %v452_v41 = vadd.f32 %v444_v46, %v394_v17 }
  0xe1   : > { %v1544_v22 = vpop.eup %1543  ;;  %v461_v35 = vadd.f32 %v1534_v62, %v403_v42  ;;  %1563 = vpow2.f32 %v2685_v14  ;;  %v447_v33 = vmul.f32 %v1538_v44, %v3566_v18  ;;  %v453_v45 = vadd.f32 %v445_v20, %v395_v2 }
  0xe2   : > { %v1546_v50 = vpop.eup %1545  ;;  %v462_v9 = vadd.f32 %v1536_v49, %v404_v13  ;;  %1565 = vpow2.f32 %v2689_v53  ;;  %v448_v56 = vmul.f32 %v1540_v15, %v3566_v18  ;;  %v454_v40 = vadd.f32 %v446_v10, %v396_v7 }
  0xe3   : > { %v1548_v23 = vpop.eup %1547  ;;  %v463_v36 = vadd.f32 %v1538_v44, %v405_v25  ;;  %1567 = vpow2.f32 %v2695_v24  ;;  %v449_v48 = vmul.f32 %v1542_v31, %v3566_v18  ;;  %v455_v58 = vadd.f32 %v447_v33, %v397_v21 }
  0xe4   : > { %v1550_v55 = vpop.eup %1549  ;;  %v464_v63 = vadd.f32 %v1540_v15, %v406_v16  ;;  %1569 = vpow2.f32 %v2699_v8  ;;  %v456_v0 = vadd.f32 %v448_v56, %v398_v4  ;;  %v465_v60 = vadd.f32 %v1542_v31, %v407_v57 }
  0xe5   : > { %v1552_v14 = vpop.eup %1551  ;;  %v500_v11 = vmul.f32 %v1544_v22, %v3567_v6  ;;  %1571 = vpow2.f32 %v2703_v30  ;;  %v457_v28 = vadd.f32 %v449_v48, %v399_v47  ;;  %v501_v12 = vmul.f32 %v1546_v50, %v3567_v6 }
  0xe6   : > { %v1554_v53 = vpop.eup %1553  ;;  %v516_v17 = vadd.f32 %v1544_v22, %v458_v3  ;;  %1573 = vpow2.f32 %v2711_v37  ;;  %v502_v42 = vmul.f32 %v1548_v23, %v3567_v6  ;;  %v517_v13 = vadd.f32 %v1546_v50, %v459_v19  ;;  %v3568_v19 = vld [vmem:[#allocation19_spill] sm:$0xff] }
  0xe7   : > { %v1556_v24 = vpop.eup %1555  ;;  %v508_v2 = vadd.f32 %v500_v11, %v450_v43  ;;  %1575 = vpow2.f32 %v2715_v5  ;;  %v503_v25 = vmul.f32 %v1550_v55, %v3567_v6  ;;  %v509_v62 = vadd.f32 %v501_v12, %v451_v27  ;;  %v3572_v12 = vld [vmem:[#allocation24_spill] sm:$0xff] }
  0xe8   : > { %v1558_v8 = vpop.eup %1557  ;;  %v518_v7 = vadd.f32 %v1548_v23, %v460_v1  ;;  %1577 = vpow2.f32 %v2723_v59  ;;  %v504_v21 = vmul.f32 %v1552_v14, %v3567_v6  ;;  %v510_v16 = vadd.f32 %v502_v42, %v452_v41  ;;  %v3573_v42 = vld [vmem:[#allocation20_spill] sm:$0xff] }
  0xe9   : > { %v1560_v30 = vpop.eup %1559  ;;  %v519_v49 = vadd.f32 %v1550_v55, %v461_v35  ;;  %1579 = vpow2.f32 %v2727_v38  ;;  %v505_v4 = vmul.f32 %v1554_v53, %v3567_v6  ;;  %v511_v57 = vadd.f32 %v503_v25, %v453_v45 }
  0xea   : > { %v1562_v37 = vpop.eup %1561  ;;  %v520_v18 = vadd.f32 %v1552_v14, %v462_v9  ;;  %1581 = vpow2.f32 %v2731_v54  ;;  %v506_v26 = vmul.f32 %v1556_v24, %v3567_v6  ;;  %v512_v44 = vadd.f32 %v504_v21, %v454_v40  ;;  %v3569_v40 = vld [vmem:[#allocation21_spill] sm:$0xff] }
  0xeb   : > { %v1564_v5 = vpop.eup %1563  ;;  %v521_v47 = vadd.f32 %v1554_v53, %v463_v36  ;;  %1583 = vpow2.f32 %v2739_v61  ;;  %v507_v34 = vmul.f32 %v1558_v8, %v3567_v6  ;;  %v513_v3 = vadd.f32 %v505_v4, %v455_v58  ;;  %v3570_v58 = vld [vmem:[#allocation22_spill] sm:$0xff] }
  0xec   : > { %v1566_v59 = vpop.eup %1565  ;;  %v522_v15 = vadd.f32 %v1556_v24, %v464_v63  ;;  %1585 = vpow2.f32 %v2743_v32  ;;  %v514_v46 = vadd.f32 %v506_v26, %v456_v0  ;;  %v523_v43 = vadd.f32 %v1558_v8, %v465_v60  ;;  %v3571_v60 = vld [vmem:[#allocation23_spill] sm:$0xff]  ;;  %v3574_v8 = vld [vmem:[#allocation25_spill] sm:$0xff] }
  0xed   : > { %v1568_v38 = vpop.eup %1567  ;;  %v558_v31 = vmul.f32 %v1560_v30, %v3568_v19  ;;  %1587 = vpow2.f32 %v2749_v52  ;;  %v515_v20 = vadd.f32 %v507_v34, %v457_v28  ;;  %v559_v27 = vmul.f32 %v1562_v37, %v3568_v19 }
  0xee   : > { %v1570_v54 = vpop.eup %1569  ;;  %v574_v1 = vadd.f32 %v1560_v30, %v516_v17  ;;  %1589 = vpow2.f32 %v2753_v39  ;;  %v560_v22 = vmul.f32 %v1564_v5, %v3568_v19  ;;  %v575_v41 = vadd.f32 %v1562_v37, %v517_v13 }
  0xef   : > { %v1572_v61 = vpop.eup %1571  ;;  %v566_v10 = vadd.f32 %v558_v31, %v508_v2  ;;  %1591 = vpow2.f32 %v2759_v29  ;;  %v561_v35 = vmul.f32 %v1566_v59, %v3568_v19  ;;  %v567_v50 = vadd.f32 %v559_v27, %v509_v62  ;;  %v3577_v31 = vld [vmem:[#allocation49_spill] sm:$0xff] }
  0xf0   : > { %v1574_v32 = vpop.eup %1573  ;;  %v576_v33 = vadd.f32 %v1564_v5, %v518_v7  ;;  %v577_v52 = vadd.f32 %v1566_v59, %v519_v49  ;;  %v562_v9 = vmul.f32 %v1568_v38, %v3568_v19  ;;  %v568_v23 = vadd.f32 %v560_v22, %v510_v16  ;;  %v3578_v22 = vld [vmem:[#allocation50_spill] sm:$0xff] }
  0xf1   : > { %v1576_v45 = vpop.eup %1575  ;;  %v578_v56 = vadd.f32 %v1568_v38, %v520_v18  ;;  %1593 = vpow2.f32 %v3569_v40  ;;  %v563_v36 = vmul.f32 %v1570_v54, %v3568_v19  ;;  %v569_v55 = vadd.f32 %v561_v35, %v511_v57  ;;  %v3575_v57 = vld [vmem:[#allocation26_spill] sm:$0xff]  ;;  %v3581_v40 = vld [vmem:[#allocation52_spill] sm:$0xff] }
  0xf2   : > { %v1578_v39 = vpop.eup %1577  ;;  %v579_v48 = vadd.f32 %v1570_v54, %v521_v47  ;;  %1595 = vpow2.f32 %v3570_v58  ;;  %v564_v63 = vmul.f32 %v1572_v61, %v3568_v19  ;;  %v570_v14 = vadd.f32 %v562_v9, %v512_v44  ;;  %v3576_v47 = vld [vmem:[#allocation15_spill] sm:$0xff] }
  0xf3   : > { %v1580_v29 = vpop.eup %1579  ;;  %v580_v0 = vadd.f32 %v1572_v61, %v522_v15  ;;  %1597 = vpow2.f32 %v3571_v60  ;;  %v565_v11 = vmul.f32 %v1574_v32, %v3568_v19  ;;  %v571_v53 = vadd.f32 %v563_v36, %v513_v3  ;;  %v3582_v36 = vld [vmem:[#allocation27_spill] sm:$0xff] }
  0xf4   : > { %v1582_v6 = vpop.eup %1581  ;;  %v581_v28 = vadd.f32 %v1574_v32, %v523_v43  ;;  %1599 = vpow2.f32 %v3572_v12  ;;  %v572_v24 = vadd.f32 %v564_v63, %v514_v46  ;;  %v616_v2 = vmul.f32 %v1576_v45, %v3573_v42 }
  0xf5   : > { %v1584_v17 = vpop.eup %1583  ;;  %v632_v13 = vadd.f32 %v1576_v45, %v574_v1  ;;  %1601 = vpow2.f32 %v3574_v8  ;;  %v573_v62 = vadd.f32 %v565_v11, %v515_v20  ;;  %v617_v7 = vmul.f32 %v1578_v39, %v3573_v42 }
  0xf6   : > { %v1586_v25 = vpop.eup %1585  ;;  %v618_v30 = vmul.f32 %v1580_v29, %v3573_v42  ;;  %v633_v21 = vadd.f32 %v1578_v39, %v575_v41  ;;  %v619_v49 = vmul.f32 %v1582_v6, %v3573_v42  ;;  %v624_v37 = vadd.f32 %v616_v2, %v566_v10 }
  0xf7   : > { %v1588_v16 = vpop.eup %1587  ;;  %v634_v4 = vadd.f32 %v1580_v29, %v576_v33  ;;  %1603 = vpow2.f32 %v3575_v57  ;;  %v620_v5 = vmul.f32 %v1584_v17, %v3573_v42  ;;  %v625_v26 = vadd.f32 %v617_v7, %v567_v50  ;;  %v3579_v50 = vld [vmem:[#allocation36_spill] sm:$0xff]  ;;  %v3583_v29 = vld [vmem:[#allocation53_spill] sm:$0xff] }
  0xf8   : > { %v1590_v18 = vpop.eup %1589  ;;  %v635_v44 = vadd.f32 %v1582_v6, %v577_v52  ;;  %1605 = vpow2.f32 %v3576_v47  ;;  %v621_v34 = vmul.f32 %v1586_v25, %v3573_v42  ;;  %v626_v3 = vadd.f32 %v618_v30, %v568_v23  ;;  %v3580_v52 = vld [vmem:[#allocation51_spill] sm:$0xff]  ;;  %v3587_v30 = vld [vmem:[#allocation57_spill] sm:$0xff] }
  0xf9   : > { %v1592_v59 = vpop.eup %1591  ;;  %v627_v15 = vadd.f32 %v619_v49, %v569_v55  ;;  %v636_v38 = vadd.f32 %v1584_v17, %v578_v56  ;;  %v622_v46 = vmul.f32 %v1588_v16, %v3573_v42  ;;  %v628_v43 = vadd.f32 %v620_v5, %v570_v14  ;;  %v3584_v14 = vld [vmem:[#allocation28_spill] sm:$0xff]  ;;  %v3589_v5 = vld [vmem:[#allocation59_spill] sm:$0xff] }
  0xfa   : > { %v637_v19 = vadd.f32 %v1586_v25, %v579_v48  ;;  %v718_v54 = vmul.f32 %v3577_v31, %v2513_v51  ;;  %v623_v27 = vmul.f32 %v1590_v18, %v3573_v42  ;;  %v629_v1 = vadd.f32 %v621_v34, %v571_v53  ;;  %v3585_v53 = vld [vmem:[#allocation29_spill] sm:$0xff] }
  0xfb   : > { %v1594_v20 = vpop.eup %1593  ;;  %v638_v61 = vadd.f32 %v1588_v16, %v580_v0  ;;  %v719_v10 = vmul.f32 %v3578_v22, %v2513_v51  ;;  %v630_v32 = vadd.f32 %v622_v46, %v572_v24  ;;  %v639_v35 = vadd.f32 %v1590_v18, %v581_v28 }
  0xfc   : > { %v1596_v41 = vpop.eup %1595  ;;  %v674_v33 = vmul.f32 %v1592_v59, %v3579_v50  ;;  %v720_v45 = vmul.f32 %v3580_v52, %v2513_v51  ;;  %v631_v23 = vadd.f32 %v623_v27, %v573_v62  ;;  %v690_v56 = vadd.f32 %v1592_v59, %v632_v13  ;;  %v3586_v13 = vld [vmem:[#allocation56_spill] sm:$0xff]  ;;  %v3597_v52 = vld [vmem:[#allocation67_spill] sm:$0xff] }
  0xfd   : > { %v1598_v9 = vpop.eup %1597  ;;  %v721_v39 = vmul.f32 %v3581_v40, %v2513_v51  ;;  %1607 = vpow2.f32 %v3582_v36  ;;  %v675_v48 = vmul.f32 %v1594_v20, %v3579_v50  ;;  %v691_v58 = vadd.f32 %v1594_v20, %v633_v21  ;;  %v3590_v59 = vld [vmem:[#allocation60_spill] sm:$0xff] }
  0xfe   : > { %v1600_v55 = vpop.eup %1599  ;;  %v722_v63 = vmul.f32 %v3583_v29, %v2513_v51  ;;  %1609 = vpow2.f32 %v3584_v14  ;;  %v676_v60 = vmul.f32 %v1596_v41, %v3579_v50  ;;  %v682_v6 = vadd.f32 %v674_v33, %v624_v37  ;;  %v3588_v37 = vld [vmem:[#allocation58_spill] sm:$0xff] }
  0xff   : > { %v1602_v0 = vpop.eup %1601  ;;  %v2905_v11 = vadd.f32 %v1596_v41, %v634_v4  ;;  %1611 = vpow2.f32 %v3585_v53  ;;  %v677_v28 = vmul.f32 %v1598_v9, %v3579_v50  ;;  %v683_v12 = vadd.f32 %v675_v48, %v625_v26  ;;  %v3595_v41 = vld [vmem:[#allocation65_spill] sm:$0xff] }
 0x100   : > { %v693_v17 = vadd.f32 %v1598_v9, %v635_v44  ;;  %1613 = vpow2.f32 %v718_v54  ;;  %v678_v42 = vmul.f32 %v1600_v55, %v3579_v50  ;;  %v684_v2 = vadd.f32 %v676_v60, %v626_v3  ;;  %v3592_v54 = vld [vmem:[#allocation62_spill] sm:$0xff]  ;;  %v3598_v9 = vld [vmem:[#allocation68_spill] sm:$0xff]  ;;  %v3600_v48 = vld [vmem:[#allocation69_spill] sm:$0xff] }
 0x101   : > { %v1604_v24 = vpop.eup %1603  ;;  %1615 = vpow2.f32 %v719_v10  ;;  %v773_v8 = vmul.f32 %v3586_v13, %v2513_v51  ;;  %v679_v62 = vmul.f32 %v1602_v0, %v3579_v50  ;;  %v694_v7 = vadd.f32 %v1600_v55, %v636_v38  ;;  %v3591_v38 = vld [vmem:[#allocation61_spill] sm:$0xff]  ;;  %v3594_v10 = vld [vmem:[#allocation64_spill] sm:$0xff]  ;;  %v3601_v60 = vld [vmem:[#allocation70_spill] sm:$0xff] }
 0x102   : > { %v1606_v25 = vpop.eup %1605  ;;  %1617 = vpow2.f32 %v720_v45  ;;  %v774_v21 = vmul.f32 %v3587_v30, %v2513_v51  ;;  %v685_v16 = vadd.f32 %v677_v28, %v627_v15  ;;  %v695_v49 = vadd.f32 %v1602_v0, %v637_v19  ;;  %v3602_v13 = vld [vmem:[#allocation71_spill] sm:$0xff] }
 0x103   : > { %1619 = vpow2.f32 %v721_v39  ;;  %v775_v4 = vmul.f32 %v3588_v37, %v2513_v51  ;;  %v680_v57 = vmul.f32 %v1604_v24, %v3579_v50  ;;  %v686_v18 = vadd.f32 %v678_v42, %v628_v43  ;;  %v3599_v39 = vld [vmem:[#allocation37_spill] sm:$0xff] }
 0x104   : > { %1621 = vpow2.f32 %v722_v63  ;;  %v776_v26 = vmul.f32 %v3589_v5, %v2513_v51  ;;  %v681_v44 = vmul.f32 %v1606_v25, %v3579_v50  ;;  %v696_v47 = vadd.f32 %v1604_v24, %v638_v61  ;;  %v3593_v61 = vld [vmem:[#allocation63_spill] sm:$0xff] }
 0x105   : > { %v777_v34 = vmul.f32 %v3590_v59, %v2513_v51  ;;  %1623 = vpow2.f32 %v773_v8  ;;  %v687_v3 = vadd.f32 %v679_v62, %v629_v1  ;;  %v697_v15 = vadd.f32 %v1606_v25, %v639_v35 }
 0x106   : > { %v778_v46 = vmul.f32 %v3591_v38, %v2513_v51  ;;  %1625 = vpow2.f32 %v774_v21  ;;  %v688_v31 = vadd.f32 %v680_v57, %v630_v32  ;;  %v689_v43 = vadd.f32 %v681_v44, %v631_v23  ;;  %v3596_v32 = vld [vmem:[#allocation66_spill] sm:$0xff] }
 0x107   : > { %v1608_v19 = vpop.eup %1607  ;;  %v779_v20 = vmul.f32 %v3592_v54, %v2513_v51  ;;  %1627 = vpow2.f32 %v775_v4  ;;  %v780_v22 = vmul.f32 %v3593_v61, %v2513_v51  ;;  %v831_v1 = vmul.f32 %v3594_v10, %v2513_v51  ;;  %v3603_v54 = vld [vmem:[#allocation73_spill] sm:$0xff] }
 0x108   : > { %v1610_v27 = vpop.eup %1609  ;;  %1629 = vpow2.f32 %v776_v26  ;;  %v832_v35 = vmul.f32 %v3595_v41, %v2513_v51  ;;  %v833_v33 = vmul.f32 %v3596_v32, %v2513_v51  ;;  %v834_v45 = vmul.f32 %v3597_v52, %v2513_v51 }
 0x109   : > { %v1612_v50 = vpop.eup %1611  ;;  %1631 = vpow2.f32 %v777_v34  ;;  %v835_v23 = vmul.f32 %v3598_v9, %v2513_v51  ;;  %v732_v36 = vmul.f32 %v1608_v19, %v3599_v39  ;;  %v748_v55 = vadd.f32 %v1608_v19, %v690_v56 }
 0x10a   : > { %v1614_v40 = vpop.eup %1613  ;;  %1633 = vpow2.f32 %v778_v46  ;;  %v836_v29 = vmul.f32 %v3600_v48, %v2513_v51  ;;  %v733_v14 = vmul.f32 %v1610_v27, %v3599_v39  ;;  %v749_v0 = vadd.f32 %v1610_v27, %v691_v58 }
 0x10b   : > { %v1616_v63 = vpop.eup %1615  ;;  %1635 = vpow2.f32 %v779_v20  ;;  %v837_v53 = vmul.f32 %v3601_v60, %v2513_v51  ;;  %v734_v24 = vmul.f32 %v1612_v50, %v3599_v39  ;;  %v740_v42 = vadd.f32 %v732_v36, %v682_v6 }
 0x10c   : > { %v1618_v28 = vpop.eup %1617  ;;  %1637 = vpow2.f32 %v780_v22  ;;  %v838_v56 = vmul.f32 %v3602_v13, %v2513_v51  ;;  %v735_v25 = vmul.f32 %v1614_v40, %v3599_v39  ;;  %v741_v62 = vadd.f32 %v733_v14, %v683_v12  ;;  %v3607_v14 = vld [vmem:[#allocation76_spill] sm:$0xff] }
 0x10d   : > { %v1620_v8 = vpop.eup %1619  ;;  %v750_v30 = vadd.f32 %v1612_v50, %v2905_v11  ;;  %v751_v21 = vadd.f32 %v1614_v40, %v693_v17  ;;  %v736_v37 = vmul.f32 %v1616_v63, %v3599_v39  ;;  %v742_v4 = vadd.f32 %v734_v24, %v684_v2 }
 0x10e   : > { %v1622_v58 = vpop.eup %1621  ;;  %v752_v57 = vadd.f32 %v1616_v63, %v694_v7  ;;  %1639 = vpow2.f32 %v831_v1  ;;  %v737_v6 = vmul.f32 %v1618_v28, %v3599_v39  ;;  %v743_v26 = vadd.f32 %v735_v25, %v685_v16 }
 0x10f   : > { %v1624_v5 = vpop.eup %1623  ;;  %v753_v44 = vadd.f32 %v1618_v28, %v695_v49  ;;  %1641 = vpow2.f32 %v832_v35  ;;  %v738_v34 = vmul.f32 %v1620_v8, %v3599_v39  ;;  %v744_v38 = vadd.f32 %v736_v37, %v686_v18  ;;  %v3604_v49 = vld [vmem:[#allocation74_spill] sm:$0xff] }
 0x110   : > { %v1626_v59 = vpop.eup %1625  ;;  %v754_v12 = vadd.f32 %v1620_v8, %v696_v47  ;;  %1643 = vpow2.f32 %v833_v33  ;;  %v739_v17 = vmul.f32 %v1622_v58, %v3599_v39  ;;  %v745_v46 = vadd.f32 %v737_v6, %v687_v3  ;;  %v3605_v18 = vld [vmem:[#allocation54_spill] sm:$0xff] }
 0x111   : > { %v1628_v11 = vpop.eup %1627  ;;  %v755_v19 = vadd.f32 %v1622_v58, %v697_v15  ;;  %1645 = vpow2.f32 %v834_v45  ;;  %v746_v7 = vadd.f32 %v738_v34, %v688_v31  ;;  %v889_v16 = vmul.f32 %v3603_v54, %v2513_v51  ;;  %v3606_v31 = vld [vmem:[#allocation75_spill] sm:$0xff] }
 0x112   : > { %v1630_v2 = vpop.eup %1629  ;;  %1647 = vpow2.f32 %v835_v23  ;;  %v890_v20 = vmul.f32 %v3604_v49, %v2513_v51  ;;  %v747_v61 = vadd.f32 %v739_v17, %v689_v43  ;;  %v790_v47 = vmul.f32 %v1624_v5, %v3605_v18  ;;  %v3610_v58 = vld [vmem:[#allocation55_spill] sm:$0xff]  ;;  %v3613_v49 = vld [vmem:[#allocation81_spill] sm:$0xff] }
 0x113   : > { %v1632_v27 = vpop.eup %1631  ;;  %v791_v22 = vmul.f32 %v1626_v59, %v3605_v18  ;;  %v806_v10 = vadd.f32 %v1624_v5, %v748_v55  ;;  %v792_v3 = vmul.f32 %v1628_v11, %v3605_v18  ;;  %v807_v15 = vadd.f32 %v1626_v59, %v749_v0 }
 0x114   : > { %v1634_v1 = vpop.eup %1633  ;;  %1649 = vpow2.f32 %v836_v29  ;;  %v891_v41 = vmul.f32 %v3606_v31, %v2513_v51  ;;  %v793_v50 = vmul.f32 %v1630_v2, %v3605_v18  ;;  %v798_v32 = vadd.f32 %v790_v47, %v740_v42  ;;  %v3608_v42 = vld [vmem:[#allocation77_spill] sm:$0xff]  ;;  %v3614_v47 = vld [vmem:[#allocation82_spill] sm:$0xff] }
 0x115   : > { %v1636_v35 = vpop.eup %1635  ;;  %v808_v33 = vadd.f32 %v1628_v11, %v750_v30  ;;  %1651 = vpow2.f32 %v837_v53  ;;  %v794_v52 = vmul.f32 %v1632_v27, %v3605_v18  ;;  %v799_v45 = vadd.f32 %v791_v22, %v741_v62  ;;  %v3609_v62 = vld [vmem:[#allocation78_spill] sm:$0xff] }
 0x116   : > { %v1638_v43 = vpop.eup %1637  ;;  %v809_v9 = vadd.f32 %v1630_v2, %v751_v21  ;;  %1653 = vpow2.f32 %v838_v56  ;;  %v795_v23 = vmul.f32 %v1634_v1, %v3605_v18  ;;  %v800_v40 = vadd.f32 %v792_v3, %v742_v4  ;;  %v3615_v3 = vld [vmem:[#allocation83_spill] sm:$0xff] }
 0x117   : > { %v801_v39 = vadd.f32 %v793_v50, %v743_v26  ;;  %v810_v36 = vadd.f32 %v1632_v27, %v752_v57  ;;  %v796_v48 = vmul.f32 %v1636_v35, %v3605_v18  ;;  %v802_v29 = vadd.f32 %v794_v52, %v744_v38  ;;  %v3611_v57 = vld [vmem:[#allocation79_spill] sm:$0xff]  ;;  %v3616_v50 = vld [vmem:[#allocation84_spill] sm:$0xff]  ;;  %v3617_v52 = vld [vmem:[#allocation85_spill] sm:$0xff] }
 0x118   : > { %v1640_v55 = vpop.eup %1639  ;;  %v811_v63 = vadd.f32 %v1634_v1, %v753_v44  ;;  %v892_v0 = vmul.f32 %v3607_v14, %v2513_v51  ;;  %v797_v53 = vmul.f32 %v1638_v43, %v3605_v18  ;;  %v803_v28 = vadd.f32 %v795_v23, %v745_v46 }
 0x119   : > { %v1642_v60 = vpop.eup %1641  ;;  %v812_v24 = vadd.f32 %v1636_v35, %v754_v12  ;;  %v893_v13 = vmul.f32 %v3608_v42, %v2513_v51  ;;  %v804_v8 = vadd.f32 %v796_v48, %v746_v7  ;;  %v813_v25 = vadd.f32 %v1638_v43, %v755_v19  ;;  %v3612_v12 = vld [vmem:[#allocation80_spill] sm:$0xff]  ;;  %v3618_v48 = vld [vmem:[#allocation86_spill] sm:$0xff]  ;;  %v3622_v42 = vld [vmem:[#allocation91_spill] sm:$0xff] }
 0x11a   : > { %v1644_v56 = vpop.eup %1643  ;;  %v894_v30 = vmul.f32 %v3609_v62, %v2513_v51  ;;  %1655 = vpow2.f32 %v889_v16  ;;  %v848_v37 = vmul.f32 %v1640_v55, %v3610_v58  ;;  %v864_v4 = vadd.f32 %v1640_v55, %v806_v10  ;;  %v3624_v62 = vld [vmem:[#allocation93_spill] sm:$0xff] }
 0x11b   : > { %v1646_v21 = vpop.eup %1645  ;;  %v895_v5 = vmul.f32 %v3611_v57, %v2513_v51  ;;  %1657 = vpow2.f32 %v890_v20  ;;  %v805_v26 = vadd.f32 %v797_v53, %v747_v61  ;;  %v849_v44 = vmul.f32 %v1642_v60, %v3610_v58  ;;  %v3626_v57 = vld [vmem:[#allocation72_spill] sm:$0xff] }
 0x11c   : > { %v1648_v6 = vpop.eup %1647  ;;  %v865_v59 = vadd.f32 %v1642_v60, %v807_v15  ;;  %1659 = vpow2.f32 %v891_v41  ;;  %v850_v34 = vmul.f32 %v1644_v56, %v3610_v58  ;;  %v856_v38 = vadd.f32 %v848_v37, %v798_v32  ;;  %v3620_v60 = vld [vmem:[#allocation88_spill] sm:$0xff] }
 0x11d   : > { %v896_v11 = vmul.f32 %v3612_v12, %v2513_v51  ;;  %1661 = vpow2.f32 %v892_v0  ;;  %v851_v46 = vmul.f32 %v1646_v21, %v3610_v58  ;;  %v857_v19 = vadd.f32 %v849_v44, %v799_v45 }
 0x11e   : > { %v1650_v17 = vpop.eup %1649  ;;  %v866_v2 = vadd.f32 %v1644_v56, %v808_v33  ;;  %1663 = vpow2.f32 %v893_v13  ;;  %v852_v54 = vmul.f32 %v1648_v6, %v3610_v58  ;;  %v867_v16 = vadd.f32 %v1646_v21, %v809_v9  ;;  %v3625_v21 = vld [vmem:[#allocation94_spill] sm:$0xff] }
 0x11f   : > { %v1652_v7 = vpop.eup %1651  ;;  %1665 = vpow2.f32 %v894_v30  ;;  %v947_v20 = vmul.f32 %v3613_v49, %v2513_v51  ;;  %v858_v61 = vadd.f32 %v850_v34, %v800_v40  ;;  %v868_v18 = vadd.f32 %v1648_v6, %v810_v36  ;;  %v3628_v34 = vld [vmem:[#allocation96_spill] sm:$0xff] }
 0x120   : > { %v1654_v27 = vpop.eup %1653  ;;  %1667 = vpow2.f32 %v895_v5  ;;  %v948_v22 = vmul.f32 %v3614_v47, %v2513_v51  ;;  %v853_v10 = vmul.f32 %v1650_v17, %v3610_v58  ;;  %v859_v1 = vadd.f32 %v851_v46, %v801_v39 }
 0x121   : > { %1669 = vpow2.f32 %v896_v11  ;;  %v949_v15 = vmul.f32 %v3615_v3, %v2513_v51  ;;  %v854_v31 = vmul.f32 %v1652_v7, %v3610_v58  ;;  %v860_v41 = vadd.f32 %v852_v54, %v802_v29  ;;  %v3629_v54 = vld [vmem:[#allocation97_spill] sm:$0xff] }
 0x122   : > { %v869_v35 = vadd.f32 %v1650_v17, %v811_v63  ;;  %v950_v32 = vmul.f32 %v3616_v50, %v2513_v51  ;;  %v855_v33 = vmul.f32 %v1654_v27, %v3610_v58  ;;  %v870_v43 = vadd.f32 %v1652_v7, %v812_v24  ;;  %v3619_v63 = vld [vmem:[#allocation87_spill] sm:$0xff]  ;;  %v3621_v24 = vld [vmem:[#allocation90_spill] sm:$0xff] }
 0x123   : > { %v951_v45 = vmul.f32 %v3617_v52, %v2513_v51  ;;  %1671 = vpow2.f32 %v947_v20  ;;  %v861_v23 = vadd.f32 %v853_v10, %v803_v28  ;;  %v862_v40 = vadd.f32 %v854_v31, %v804_v8  ;;  %v3623_v8 = vld [vmem:[#allocation92_spill] sm:$0xff] }
 0x124   : > { %v1656_v9 = vpop.eup %1655  ;;  %v871_v39 = vadd.f32 %v1654_v27, %v813_v25  ;;  %1673 = vpow2.f32 %v948_v22  ;;  %v863_v55 = vadd.f32 %v855_v33, %v805_v26  ;;  %v952_v29 = vmul.f32 %v3618_v48, %v2513_v51  ;;  %v3627_v26 = vld [vmem:[#allocation95_spill] sm:$0xff] }
 0x125   : > { %v1658_v36 = vpop.eup %1657  ;;  %v953_v14 = vmul.f32 %v3619_v63, %v2513_v51  ;;  %1675 = vpow2.f32 %v949_v15  ;;  %v954_v53 = vmul.f32 %v3620_v60, %v2513_v51  ;;  %v1005_v28 = vmul.f32 %v3621_v24, %v2513_v51  ;;  %v3630_v48 = vld [vmem:[#allocation99_spill] sm:$0xff]  ;;  %v3633_v60 = vld [vmem:[#allocation101_spill] sm:$0xff] }
 0x126   : > { %v1660_v0 = vpop.eup %1659  ;;  %1677 = vpow2.f32 %v950_v32  ;;  %v1006_v13 = vmul.f32 %v3622_v42, %v2513_v51  ;;  %v1007_v25 = vmul.f32 %v3623_v8, %v2513_v51  ;;  %v1008_v30 = vmul.f32 %v3624_v62, %v2513_v51 }
 0x127   : > { %v1662_v56 = vpop.eup %1661  ;;  %1679 = vpow2.f32 %v951_v45  ;;  %v1009_v58 = vmul.f32 %v3625_v21, %v2513_v51  ;;  %v906_v5 = vmul.f32 %v1656_v9, %v3626_v57  ;;  %v922_v6 = vadd.f32 %v1656_v9, %v864_v4 }
 0x128   : > { %v1664_v37 = vpop.eup %1663  ;;  %v1010_v44 = vmul.f32 %v3627_v26, %v2513_v51  ;;  %v1011_v12 = vmul.f32 %v3628_v34, %v2513_v51  ;;  %v907_v17 = vmul.f32 %v1658_v36, %v3626_v57  ;;  %v908_v46 = vmul.f32 %v1660_v0, %v3626_v57  ;;  %v1768_v26 = vld [vmem:[%s2092_s11 + $0x20] sm:$0xff] }
 0x129   : > { %v1666_v11 = vpop.eup %1665  ;;  %v923_v7 = vadd.f32 %v1658_v36, %v865_v59  ;;  %v1012_v49 = vmul.f32 %v3629_v54, %v2513_v51  ;;  %v909_v27 = vmul.f32 %v1662_v56, %v3626_v57  ;;  %v914_v47 = vadd.f32 %v906_v5, %v856_v38  ;;  %v3636_v5 = vld [vmem:[#allocation102_spill] sm:$0xff] }
 0x12a   : > { %v1668_v20 = vpop.eup %1667  ;;  %v924_v4 = vadd.f32 %v1660_v0, %v866_v2  ;;  %1681 = vpow2.f32 %v952_v29  ;;  %v910_v10 = vmul.f32 %v1664_v37, %v3626_v57  ;;  %v915_v3 = vadd.f32 %v907_v17, %v857_v19  ;;  %v1770_v17 = vld [vmem:[%s2092_s11 + $0x30] sm:$0xff] }
 0x12b   : > { %v1670_v22 = vpop.eup %1669  ;;  %v925_v15 = vadd.f32 %v1662_v56, %v867_v16  ;;  %1683 = vpow2.f32 %v953_v14  ;;  %v911_v31 = vmul.f32 %v1666_v11, %v3626_v57  ;;  %v3024_v50 = vadd.f32 %v908_v46, %v858_v61  ;;  %v3632_v14 = vld [vmem:[#allocation89_spill] sm:$0xff] }
 0x12c   : > { %v3026_v59 = vadd.f32 %v1664_v37, %v868_v18  ;;  %1685 = vpow2.f32 %v954_v53  ;;  %v912_v33 = vmul.f32 %v1668_v20, %v3626_v57  ;;  %v3029_v52 = vadd.f32 %v909_v27, %v859_v1 }
 0x12d   : > { %v1672_v32 = vpop.eup %1671  ;;  %v3031_v38 = vadd.f32 %v1666_v11, %v869_v35  ;;  %1687 = vpow2.f32 %v1005_v28  ;;  %v913_v19 = vmul.f32 %v1670_v22, %v3626_v57  ;;  %v3034_v16 = vadd.f32 %v910_v10, %v860_v41  ;;  %v3631_v41 = vld [vmem:[#allocation100_spill] sm:$0xff]  ;;  %v3078_v57 = vld [vmem:[%s2092_s11 + $0x18] sm:$0xff] }
 0x12e   : > { %v1674_v2 = vpop.eup %1673  ;;  %v3036_v45 = vadd.f32 %v1668_v20, %v870_v43  ;;  %1689 = vpow2.f32 %v1006_v13  ;;  %v3038_v18 = vadd.f32 %v911_v31, %v861_v23  ;;  %v3040_v9 = vadd.f32 %v912_v33, %v862_v40  ;;  %v3638_v20 = vld [vmem:[#allocation105_spill] sm:$0xff]  ;;  %v3640_v31 = vld [vmem:[#allocation106_spill] sm:$0xff] }
 0x12f   : > { %v1676_v61 = vpop.eup %1675  ;;  %v3042_v36 = vadd.f32 %v1670_v22, %v871_v39  ;;  %1691 = vpow2.f32 %v1007_v25  ;;  %v3044_v35 = vadd.f32 %v913_v19, %v863_v55  ;;  %v1063_v29 = vmul.f32 %v3630_v48, %v2513_v51  ;;  %v3639_v22 = vld [vmem:[#allocation109_spill] sm:$0xff]  ;;  %v3641_v33 = vld [vmem:[#allocation110_spill] sm:$0xff] }
 0x130   : > { %v1678_v1 = vpop.eup %1677  ;;  %1693 = vpow2.f32 %v1008_v30  ;;  %v1064_v43 = vmul.f32 %v3631_v41, %v2513_v51  ;;  %v964_v0 = vmul.f32 %v1672_v32, %v3632_v14  ;;  %v965_v23 = vmul.f32 %v1674_v2, %v3632_v14  ;;  %v3634_v30 = vld [vmem:[#allocation103_spill] sm:$0xff] }
 0x131   : > { %v1680_v63 = vpop.eup %1679  ;;  %v3052_v40 = vadd.f32 %v1672_v32, %v922_v6  ;;  %1695 = vpow2.f32 %v1009_v58  ;;  %v966_v39 = vmul.f32 %v1676_v61, %v3632_v14  ;;  %v3055_v55 = vadd.f32 %v1674_v2, %v923_v7  ;;  %v3635_v58 = vld [vmem:[#allocation104_spill] sm:$0xff] }
 0x132   : > { %1697 = vpow2.f32 %v1010_v44  ;;  %v1065_v53 = vmul.f32 %v3633_v60, %v2513_v51  ;;  %v967_v24 = vmul.f32 %v1678_v1, %v3632_v14  ;;  %v3060_v28 = vadd.f32 %v964_v0, %v914_v47  ;;  %v3637_v7 = vld [vmem:[#allocation108_spill] sm:$0xff]  ;;  %v1771_v47 = vld [vmem:[%s2092_s11 + $0x38] sm:$0xff] }
 0x133   : > { %v3062_v42 = vadd.f32 %v1676_v61, %v924_v4  ;;  %1699 = vpow2.f32 %v1011_v12  ;;  %v3065_v56 = vmul.f32 %v1680_v63, %v3632_v14  ;;  %v3067_v8 = vadd.f32 %v965_v23, %v915_v3  ;;  %v1769_v12 = vld [vmem:[%s2092_s11 + $0x28] sm:$0xff]  ;;  %v3642_v61 = vld [vmem:[#allocation107_spill] sm:$0xff] }
 0x134   : > { %v1682_v13 = vpop.eup %1681  ;;  %v3069_v25 = vadd.f32 %v1678_v1, %v925_v15  ;;  %1701 = vpow2.f32 %v1012_v49  ;;  %v1066_v21 = vmul.f32 %v3634_v30, %v2513_v51  ;;  %v1067_v37 = vmul.f32 %v3635_v58, %v2513_v51 }
 0x135   : > { %v3071_v62 = vpop.eup %1683  ;;  %v1108_v6 = vsub.f32 %v3078_v57, %v3636_v5  ;;  %v1109_v44 = vsub.f32 %v1768_v26, %v3636_v5  ;;  %1703 = vpow2.f32 %v1063_v29  ;;  %v1110_v11 = vsub.f32 %v1769_v12, %v3636_v5 }
 0x136   : > { %v3084_v34 = vpop.eup %1685  ;;  %v1111_v46 = vsub.f32 %v1770_v17, %v3636_v5  ;;  %v1113_v54 = vmul.f32 %v3637_v7, %v3637_v7  ;;  %v1068_v27 = vmul.f32 %v3638_v20, %v2513_v51  ;;  %1705 = vpow2.f32 %v1064_v43  ;;  %v1772_v7 = vld [vmem:[%s2092_s11] sm:$0xff] }
 0x137   : > { %v3094_v49 = vpop.eup %1687  ;;  %v1112_v4 = vsub.f32 %v1771_v47, %v3636_v5  ;;  %v1114_v10 = vmul.f32 %v3639_v22, %v3639_v22  ;;  %v3105_v15 = vadd.f32 %v966_v39, %v3024_v50  ;;  %v1069_v32 = vmul.f32 %v3640_v31, %v2513_v51 }
 0x138   : > { %v3102_v3 = vpop.eup %1689  ;;  %1707 = vpow2.f32 %v1065_v53  ;;  %v1115_v2 = vmul.f32 %v3641_v33, %v3641_v33  ;;  %v1070_v1 = vmul.f32 %v3642_v61, %v2513_v51  ;;  %v1116_v48 = vmul.f32 %v1108_v6, %v1108_v6 }
 0x139   : > { %v3111_v19 = vpop.eup %1691  ;;  %1709 = vpow2.f32 %v1066_v21  ;;  %v1117_v29 = vmul.f32 %v1109_v44, %v1109_v44  ;;  %v1118_v50 = vmul.f32 %v1110_v11, %v1110_v11  ;;  %v1119_v43 = vmul.f32 %v1111_v46, %v1111_v46 }
 0x13a   : > { %v3115_v41 = vpop.eup %1693  ;;  %1711 = vpow2.f32 %v1067_v37  ;;  %v1121_v0 = vmul.f32 %v1113_v54, %v2513_v51  ;;  %v3121_v39 = vadd.f32 %v1680_v63, %v3026_v59  ;;  %v1120_v60 = vmul.f32 %v1112_v4, %v1112_v4 }
 0x13b   : > { %v3118_v23 = vpop.eup %1695  ;;  %1713 = vpow2.f32 %v1068_v27  ;;  %v1122_v53 = vmul.f32 %v1114_v10, %v2513_v51  ;;  %v969_v21 = vmul.f32 %v1682_v13, %v3632_v14  ;;  %v3128_v58 = vadd.f32 %v967_v24, %v3029_v52  ;;  %v1774_v27 = vld [vmem:[%s2092_s11 + $0x10] sm:$0xff] }
 0x13c   : > { %v3124_v30 = vpop.eup %1697  ;;  %1715 = vpow2.f32 %v1069_v32  ;;  %v1123_v37 = vmul.f32 %v1115_v2, %v2513_v51  ;;  %v3134_v59 = vadd.f32 %v1682_v13, %v3031_v38  ;;  %v1124_v63 = vmul.f32 %v1116_v48, %v2513_v51  ;;  %v1773_v13 = vld [vmem:[%s2092_s11 + $0x8] sm:$0xff]  ;;  %s3206_s11 = sld [smem:[#allocation7 + $0xd]] }
 0x13d   : > { %v3131_v5 = vpop.eup %1699  ;;  %1717 = vpow2.f32 %v1070_v1  ;;  %v1125_v6 = vmul.f32 %v1117_v29, %v2513_v51  ;;  %v1126_v52 = vmul.f32 %v1118_v50, %v2513_v51  ;;  %v1127_v24 = vmul.f32 %v1119_v43, %v2513_v51 }
 0x13e   : > { %v3138_v44 = vpop.eup %1701  ;;  %1719 = vpow2.f32 %v1121_v0  ;;  %v1162_v11 = vstv %s3086_s16  ;;  %v1128_v46 = vmul.f32 %v1120_v60, %v2513_v51  ;;  %v970_v0 = vmul.f32 %v3071_v62, %v3632_v14 }
 0x13f   : > { %1721 = vpow2.f32 %v1122_v53  ;;  %v1163_v38 = vsub.f32 %v1772_v7, %v1162_v11  ;;  %v1164_v54 = vsub.f32 %v1773_v13, %v1162_v11  ;;  %v3146_v20 = vpop.eup %1703  ;;  %v1165_v4 = vsub.f32 %v1774_v27, %v1162_v11 }
 0x140   : > { %1723 = vpow2.f32 %v1123_v37  ;;  %v1166_v22 = vsub.f32 %v3078_v57, %v1162_v11  ;;  %v1167_v10 = vsub.f32 %v1768_v26, %v1162_v11  ;;  %v3150_v31 = vpop.eup %1705  ;;  %v1168_v32 = vsub.f32 %v1769_v12, %v1162_v11 }
 0x141   : > { %1725 = vpow2.f32 %v1124_v63  ;;  %v1169_v33 = vsub.f32 %v1770_v17, %v1162_v11  ;;  %v1170_v2 = vsub.f32 %v1771_v47, %v1162_v11  ;;  %v1171_v1 = vmul.f32 %v1163_v38, %v1163_v38 }
 0x142   : > { %v3152_v61 = vpop.eup %1707  ;;  %v1172_v48 = vmul.f32 %v1164_v54, %v1164_v54  ;;  %v1173_v29 = vmul.f32 %v1165_v4, %v1165_v4  ;;  %v1174_v50 = vmul.f32 %v1166_v22, %v1166_v22  ;;  %v3160_v57 = vadd.f32 %v3065_v56, %v3034_v16 }
 0x143   : > { %v3154_v43 = vpop.eup %1709  ;;  %1727 = vpow2.f32 %v1125_v6  ;;  %v1175_v26 = vmul.f32 %v1167_v10, %v1167_v10  ;;  %v1176_v17 = vmul.f32 %v1168_v32, %v1168_v32  ;;  %v1179_v47 = vmul.f32 %v1171_v1, %v2513_v51  ;;  %v3643_v10 = vld [vmem:[#allocation98_spill] sm:$0xff] }
 0x144   : > { %v3162_v12 = vpop.eup %1711  ;;  %1729 = vpow2.f32 %v1126_v52  ;;  %v1180_v60 = vmul.f32 %v1172_v48, %v2513_v51  ;;  %v986_v37 = vadd.f32 %v3071_v62, %v3036_v45  ;;  %v1177_v63 = vmul.f32 %v1169_v33, %v1169_v33 }
 0x145   : > { %v3166_v53 = vpop.eup %1713  ;;  %1731 = vpow2.f32 %v1127_v24  ;;  %v1181_v16 = vmul.f32 %v1173_v29, %v2513_v51  ;;  %v1038_v6 = vadd.f32 %v3094_v49, %v3052_v40  ;;  %v1178_v52 = vmul.f32 %v1170_v2, %v1170_v2 }
 0x146   : > { %v3171_v56 = vpop.eup %1715  ;;  %1733 = vpow2.f32 %v1128_v46  ;;  %v1182_v11 = vmul.f32 %v1174_v50, %v2513_v51  ;;  %v971_v38 = vmul.f32 %v3084_v34, %v3632_v14  ;;  %v1039_v45 = vadd.f32 %v3102_v3, %v3055_v55 }
 0x147   : > { %v3176_v7 = vpop.eup %1717  ;;  %v1183_v62 = vmul.f32 %v1175_v26, %v2513_v51  ;;  %1735 = vpow2.f32 %v1179_v47  ;;  %v3186_v13 = vadd.f32 %v969_v21, %v3038_v18  ;;  %v1040_v40 = vadd.f32 %v3111_v19, %v3062_v42 }
 0x148   : > { %v3183_v24 = vpop.eup %1719  ;;  %v1184_v46 = vmul.f32 %v1176_v17, %v2513_v51  ;;  %1737 = vpow2.f32 %v1180_v60  ;;  %v987_v14 = vadd.f32 %v3084_v34, %v3042_v36  ;;  %v1041_v55 = vadd.f32 %v3115_v41, %v3069_v25 }
 0x149   : > { %v3191_v54 = vpop.eup %1721  ;;  %v1185_v27 = vmul.f32 %v1177_v63, %v2513_v51  ;;  %1739 = vpow2.f32 %v1181_v16  ;;  %v1042_v18 = vadd.f32 %v3118_v23, %v3121_v39  ;;  %v1096_v42 = vadd.f32 %v3146_v20, %v1038_v6 }
 0x14a   : > { %v3198_v4 = vpop.eup %1723  ;;  %v1186_v21 = vmul.f32 %v1178_v52, %v2513_v51  ;;  %1741 = vpow2.f32 %v1182_v11  ;;  %v978_v36 = vadd.f32 %v970_v0, %v3040_v9  ;;  %v1043_v25 = vadd.f32 %v3124_v30, %v3134_v59 }
 0x14b   : > { %v3204_v22 = vpop.eup %1725  ;;  %v1097_v34 = vadd.f32 %v3150_v31, %v1039_v45  ;;  %1743 = vpow2.f32 %v1183_v62  ;;  %v1022_v39 = vmul.f32 %v3094_v49, %v3643_v10  ;;  %v1044_v32 = vadd.f32 %v3131_v5, %v986_v37 }
 0x14c   : > { %v1098_v51 = vadd.f32 %v3152_v61, %v1040_v40  ;;  %1745 = vpow2.f32 %v1184_v46  ;;  %v979_v2 = vadd.f32 %v971_v38, %v3044_v35  ;;  %v1045_v9 = vadd.f32 %v3138_v44, %v987_v14 }
 0x14d   : > { %v3216_v33 = vpop.eup %1727  ;;  %v1099_v1 = vadd.f32 %v3154_v43, %v1041_v55  ;;  %1747 = vpow2.f32 %v1185_v27  ;;  %v1023_v48 = vmul.f32 %v3102_v3, %v3643_v10  ;;  %v1100_v49 = vadd.f32 %v3162_v12, %v1042_v18 }
 0x14e   : > { %v3221_v59 = vpop.eup %1729  ;;  %v1154_v29 = vadd.f32 %v3183_v24, %v1096_v42  ;;  %1749 = vpow2.f32 %v1186_v21  ;;  %v1024_v35 = vmul.f32 %v3111_v19, %v3643_v10  ;;  %v1030_v0 = vadd.f32 %v1022_v39, %v3060_v28 }
 0x14f   : > { %v3227_v50 = vpop.eup %1731  ;;  %v1101_v26 = vadd.f32 %v3166_v53, %v1043_v25  ;;  %v1155_v17 = vadd.f32 %v3191_v54, %v1097_v34  ;;  %v1025_v3 = vmul.f32 %v3115_v41, %v3643_v10  ;;  %v1031_v60 = vadd.f32 %v1023_v48, %v3067_v8 }
 0x150   : > { %v3234_v47 = vpop.eup %1733  ;;  %v1102_v37 = vadd.f32 %v3171_v56, %v1044_v32  ;;  %v1156_v63 = vadd.f32 %v3198_v4, %v1098_v51  ;;  %v1026_v28 = vmul.f32 %v3118_v23, %v3643_v10  ;;  %v1032_v19 = vadd.f32 %v1024_v35, %v3105_v15 }
 0x151   : > { %v3241_v16 = vpop.eup %1735  ;;  %v1103_v6 = vadd.f32 %v3176_v7, %v1045_v9  ;;  %v1157_v52 = vadd.f32 %v3204_v22, %v1099_v1  ;;  %v1027_v8 = vmul.f32 %v3124_v30, %v3643_v10  ;;  %v1033_v41 = vadd.f32 %v1025_v3, %v3128_v58 }
 0x152   : > { %v3248_v11 = vpop.eup %1737  ;;  %v1158_v38 = vadd.f32 %v3216_v33, %v1100_v49  ;;  %v1212_v45 = vadd.f32 %v3241_v16, %v1154_v29  ;;  %v1028_v15 = vmul.f32 %v3131_v5, %v3643_v10  ;;  %v1079_v62 = vstv %s3206_s11 }
 0x153   : > { %v3257_v23 = vpop.eup %1739  ;;  %v1159_v40 = vadd.f32 %v3221_v59, %v1101_v26  ;;  %v1213_v46 = vadd.f32 %v3248_v11, %v1155_v17  ;;  %v1029_v30 = vmul.f32 %v3138_v44, %v3643_v10  ;;  %v1034_v58 = vadd.f32 %v1026_v28, %v3160_v57 }
 0x154   : > { %v3264_v14 = vpop.eup %1741  ;;  %v1160_v55 = vadd.f32 %v3227_v50, %v1102_v37  ;;  %v1214_v27 = vadd.f32 %v3257_v23, %v1156_v63  ;;  %v1035_v5 = vadd.f32 %v1027_v8, %v3186_v13  ;;  %v1036_v42 = vadd.f32 %v1028_v15, %v978_v36 }
 0x155   : > { %v3271_v18 = vpop.eup %1743  ;;  %v1161_v21 = vadd.f32 %v3234_v47, %v1103_v6  ;;  %v1215_v25 = vadd.f32 %v3264_v14, %v1157_v52  ;;  %v1037_v44 = vadd.f32 %v1029_v30, %v979_v2  ;;  %v1080_v57 = vmul.f32 %v3146_v20, %v1079_v62 }
 0x156   : > { %v3276_v34 = vpop.eup %1745  ;;  %v1216_v10 = vadd.f32 %v3271_v18, %v1158_v38  ;;  %v1220_v39 = vmax.f32 %v1212_v45, 1e-30  ;;  %v1081_v13 = vmul.f32 %v3150_v31, %v1079_v62  ;;  %v1082_v36 = vmul.f32 %v3152_v61, %v1079_v62 }
 0x157   : > { %v3282_v32 = vpop.eup %1747  ;;  %v1217_v51 = vadd.f32 %v3276_v34, %v1159_v40  ;;  %v1221_v9 = vmax.f32 %v1213_v46, 1e-30  ;;  %v1083_v48 = vmul.f32 %v3154_v43, %v1079_v62  ;;  %v1088_v2 = vadd.f32 %v1080_v57, %v1030_v0 }
 0x158   : > { %v3287_v1 = vpop.eup %1749  ;;  %v1218_v20 = vadd.f32 %v3282_v32, %v1160_v55  ;;  %v1222_v49 = vmax.f32 %v1214_v27, 1e-30  ;;  %v1084_v29 = vmul.f32 %v3162_v12, %v1079_v62  ;;  %v1089_v35 = vadd.f32 %v1081_v13, %v1031_v60 }
 0x159   : > { %v1219_v26 = vadd.f32 %v3287_v1, %v1161_v21  ;;  %v1223_v17 = vmax.f32 %v1215_v25, 1e-30  ;;  %v1090_v31 = vadd.f32 %v1082_v36, %v1032_v19  ;;  %v1137_v3 = vstv %s3250_s21 }
 0x15a   : > { %v1224_v61 = vmax.f32 %v1216_v10, 1e-30  ;;  %1751 = vrcp.f32 %v1220_v39  ;;  %v1085_v37 = vmul.f32 %v3166_v53, %v1079_v62  ;;  %v1091_v63 = vadd.f32 %v1083_v48, %v1033_v41 }
 0x15b   : > { %v1225_v28 = vmax.f32 %v1217_v51, 1e-30  ;;  %1753 = vrcp.f32 %v1221_v9  ;;  %v1086_v43 = vmul.f32 %v3171_v56, %v1079_v62  ;;  %v1092_v0 = vadd.f32 %v1084_v29, %v1034_v58 }
 0x15c   : > { %v1226_v6 = vmax.f32 %v1218_v20, 1e-30  ;;  %1755 = vrcp.f32 %v1222_v49  ;;  %v1087_v12 = vmul.f32 %v3176_v7, %v1079_v62  ;;  %v1138_v60 = vmul.f32 %v3183_v24, %v1137_v3 }
 0x15d   : > { %v1227_v52 = vmax.f32 %v1219_v26, 1e-30  ;;  %1757 = vrcp.f32 %v1223_v17  ;;  %v1093_v19 = vadd.f32 %v1085_v37, %v1035_v5  ;;  %v1139_v8 = vmul.f32 %v3191_v54, %v1137_v3 }
 0x15e   : > { %v1195_v38 = vstv %s3278_s27  ;;  %1759 = vrcp.f32 %v1224_v61  ;;  %v1094_v53 = vadd.f32 %v1086_v43, %v1036_v42  ;;  %v1140_v41 = vmul.f32 %v3198_v4, %v1137_v3 }
 0x15f   : > { %v1146_v45 = vadd.f32 %v1138_v60, %v1088_v2  ;;  %1761 = vrcp.f32 %v1225_v28  ;;  %v1095_v56 = vadd.f32 %v1087_v12, %v1037_v44  ;;  %v1141_v15 = vmul.f32 %v3204_v22, %v1137_v3 }
 0x160   : > { %v1147_v40 = vadd.f32 %v1139_v8, %v1089_v35  ;;  %1763 = vrcp.f32 %v1226_v6  ;;  %v1142_v7 = vmul.f32 %v3216_v33, %v1137_v3  ;;  %v1148_v24 = vadd.f32 %v1140_v41, %v1090_v31 }
 0x161   : > { %v1196_v62 = vmul.f32 %v3241_v16, %v1195_v38  ;;  %1765 = vrcp.f32 %v1227_v52  ;;  %v1143_v54 = vmul.f32 %v3221_v59, %v1137_v3  ;;  %v1144_v46 = vmul.f32 %v3227_v50, %v1137_v3 }
 0x162   : > { %v1149_v30 = vadd.f32 %v1141_v15, %v1091_v63  ;;  %v1197_v4 = vmul.f32 %v3248_v11, %v1195_v38  ;;  %v1145_v58 = vmul.f32 %v3234_v47, %v1137_v3  ;;  %v1150_v55 = vadd.f32 %v1142_v7, %v1092_v0 }
 0x163   : > { %v1198_v22 = vmul.f32 %v3257_v23, %v1195_v38  ;;  %v1204_v27 = vadd.f32 %v1196_v62, %v1146_v45  ;;  %v1151_v42 = vadd.f32 %v1143_v54, %v1093_v19  ;;  %v1199_v33 = vmul.f32 %v3264_v14, %v1195_v38 }
 0x164   : > { %v1752_v5 = vpop.eup %1751  ;;  %v1205_v21 = vadd.f32 %v1197_v4, %v1147_v40  ;;  %v1152_v59 = vadd.f32 %v1144_v46, %v1094_v53  ;;  %v1200_v50 = vmul.f32 %v3271_v18, %v1195_v38  ;;  %v1153_v57 = vadd.f32 %v1145_v58, %v1095_v56 }
 0x165   : > { %v1754_v16 = vpop.eup %1753  ;;  %v1206_v25 = vadd.f32 %v1198_v22, %v1148_v24  ;;  %v1236_v44 = vmul.f32 %v1752_v5, %v1204_v27  ;;  %v1201_v47 = vmul.f32 %v3276_v34, %v1195_v38  ;;  %v1207_v10 = vadd.f32 %v1199_v33, %v1149_v30 }
 0x166   : > { %v1756_v11 = vpop.eup %1755  ;;  %v1237_v23 = vmul.f32 %v1754_v16, %v1205_v21  ;;  %v1202_v13 = vmul.f32 %v3282_v32, %v1195_v38  ;;  %v1208_v36 = vadd.f32 %v1200_v50, %v1150_v55  ;;  %v1203_v34 = vmul.f32 %v3287_v1, %v1195_v38 }
 0x167   : > { %v1758_v39 = vpop.eup %1757  ;;  %v1238_v14 = vmul.f32 %v1756_v11, %v1206_v25  ;;  %1245 = vst.msk [vmem:[%s3315_s23] sm:$0xff] %vm1244_vm0, %v1236_v44  ;;  %v1209_v51 = vadd.f32 %v1201_v47, %v1151_v42 }
 0x168   : > { %v1760_v18 = vpop.eup %1759  ;;  %v1239_v9 = vmul.f32 %v1758_v39, %v1207_v10  ;;  %1246 = vst.msk [vmem:[%s3315_s23 + $0x8] sm:$0xff] %vm1244_vm0, %v1237_v23  ;;  %v1210_v48 = vadd.f32 %v1202_v13, %v1152_v59  ;;  %v1211_v49 = vadd.f32 %v1203_v34, %v1153_v57  ;;  %1260 = sbr.rel (!%p3644_p2) target bundleno = 395 (0x18b), region = 52 }
 0x169   : > { %v1762_v32 = vpop.eup %1761  ;;  %v1240_v2 = vmul.f32 %v1760_v18, %v1208_v36  ;;  %1247 = vst.msk [vmem:[%s3315_s23 + $0x10] sm:$0xff] %vm1244_vm0, %v1238_v14 }
 0x16a   : > { %v1764_v20 = vpop.eup %1763  ;;  %v1241_v29 = vmul.f32 %v1762_v32, %v1209_v51  ;;  %1248 = vst.msk [vmem:[%s3315_s23 + $0x18] sm:$0xff] %vm1244_vm0, %v1239_v9 }
 0x16b   : > { %v1766_v35 = vpop.eup %1765  ;;  %v1242_v1 = vmul.f32 %v1764_v20, %v1210_v48  ;;  %1249 = vst.msk [vmem:[%s3315_s23 + $0x20] sm:$0xff] %vm1244_vm0, %v1240_v2 }
 0x16c   : > { %v1243_v26 = vmul.f32 %v1766_v35, %v1211_v49  ;;  %1250 = vst.msk [vmem:[%s3315_s23 + $0x28] sm:$0xff] %vm1244_vm0, %v1241_v29 }
 0x16d   : > { %1251 = vst.msk [vmem:[%s3315_s23 + $0x30] sm:$0xff] %vm1244_vm0, %v1242_v1 }
 0x16e   : > { %1252 = vst.msk [vmem:[%s3315_s23 + $0x38] sm:$0xff] %vm1244_vm0, %v1243_v26 }
 0x16f   : > { %s3653_s6 = smov (!%p1263_p7, %s1262_s6), 8 }
 0x170   : > { %s3338_s8 = sshll.u32 %s3653_s6, 7 }
 0x171   : > { %s1267_s26 = ssub.s32 1024, %s3338_s8 }
 0x172   : > { %1268 = vsyncadd %s1254_s30, %s1267_s26  ;;  %p1418_p12 = scmp.ne.s32.totalorder %s3338_s8, 0  ;;  %s1425_s28 = sshll.u32 %s1967_s2, 10 }
 0x173   : > { %s3348_s7 = scalar_lea.hbm %s3400_s4, %s1425_s28  ;;  %s1273_s12 = sshll.u32 %s3315_s23, 4  ;;  %s3351_s12 = int_to_ptr.vmem [resolvable:$true] %s1273_s12 }
 0x174   : > { %s1833_s13 = scalar_lea.vmem %s3351_s12, %s3338_s8  ;;  %s1915_s14 = smov [#allocation10]  }
 0x175   : > { %p1834_p11 = scmp.ne.s32.totalorder %s3351_s12, %s1833_s13  ;;  %s1837_s15 = sshll.u32 %s1915_s14, 4  ;;  %s1838_s15 = int_to_ptr.vmem [resolvable:$false] %s1837_s15 }
 0x176   : > { %s1839_s2 = scalar_lea.vmem %s1838_s15, 2048  ;;  %p1840_p13 = scmp.lt.s32.totalorder %s3351_s12, %s1838_s15 }
 0x177   : > { %p1835_p4 = pnand %p1834_p11, %p1418_p12  ;;  %p1841_p3 = scmp.lt.s32.totalorder %s1839_s2, %s1833_s13 }
 0x179   : > { %p1836_p6 = pneg %p1835_p4  ;;  %p1842_p0 = por %p1841_p3, %p1840_p13 }
 0x17b   : > { %p1843_p8 = pnand %p1842_p0, %p1836_p6 }
 0x17d   : > { %1846 = shalt.err (!%p1843_p8)
}
 0x17e   : > { %s1847_s16 = scalar_lea.hbm %s3348_s7, %s3338_s8  ;;  %s1851_s27 = scalar_lea.hbm %s3400_s4, 3200 }
 0x17f   : > { %p1848_p9 = scmp.ne.s32.totalorder %s3348_s7, %s1847_s16  ;;  %p1852_p5 = scmp.lt.u32.totalorder %s3348_s7, %s3400_s4 }
 0x180   : > { %p1853_p2 = scmp.lt.u32.totalorder %s1851_s27, %s1847_s16  ;;  %p1855_p11 = scmp.lt.u32.totalorder %s1847_s16, %s3348_s7 }
 0x181   : > { %p1849_p10 = pnand %p1848_p9, %p1418_p12 }
 0x182   : > { %p1854_p7 = por %p1853_p2, %p1852_p5 }
 0x183   : > { %p1850_p1 = pneg %p1849_p10 }
 0x184   : > { %p1856_p4 = por %p1855_p11, %p1854_p7 }
 0x186   : > { %p1857_p6 = pnand %p1856_p4, %p1850_p1 }
 0x188   : > { %1860 = shalt.err (!%p1857_p6)
}
 0x189   : > { %s1916_s6 = smov 128   ;;  %s1917_s26 = smov 8  }
 0x18a   : > { %1279 = dma.vmem_to_hbm [thread:$0]  (%p1418_p12), %s3351_s12, %s3338_s8, %s3348_s7, %s1254_s30, %s1916_s6, %s1916_s6, %s1917_s26  }
 0x18b PF: > { %p1453_p13 = scmp.ge.s32.totalorder %s1907_s20, 2  ;;  %s1288_s28 = sand.u32 1, %s1895_s17  }
 0x18c   : > { %p3645_p3 = scmp.ne.s32.totalorder %s3422_s29, 0  ;;  %s1289_s9 = scalar_lea.sflag [#allocation5], %s1288_s28 }
 0x18e   : > { %p1446_p0 = pnand %p1453_p13, %p3645_p3 }
 0x190   : > { %1890 = dma.done.wait (!%p1446_p0), %s1289_s9, 1024  }
 0x191   : > { %1892 = vsyncadd (!%p1446_p0), %s1289_s9, 4294966272  ;;  %p20_p8 = scmp.ge.s32.totalorder %s1971_s22, 6   ;;  %s3646_s17 = smov %s1899_s18 }
 0x192   : > { %s3647_s18 = smov %s1903_s19  ;;  %s3648_s19 = smov %s1983_s25 }
 0x193   : > { %s3649_s20 = smov %s1971_s22  ;;  %22 = sbr.rel (!%p20_p8) target bundleno = 9 (0x9), region = 90 }
 0x19a   :  { %1294 = vsyncpa [#allocation4], 1 }
 0x19b   :  { %1296 = vsyncpa [#allocation4 + $0x1], 1 }
 0x19c   :  { %1297 = vsyncpa [#allocation5], 1 }
 0x19d   :  { %1299 = vsyncpa [#allocation5 + $0x1], 1 }
 0x19e   :  { %1300 = vsyncpa [#allocation6], 1 }
 0x19f   :  { %1302 = vsyncpa [#allocation6 + $0x1], 1 }
 0x1a0   :  { %1303 = vsyncpa [#allocation8], 1 }

</bundles_post_ra>
